<compile_context>
chip_gen: v7x
topology: tpu7x:2x2x1
jax: 0.10.0
libtpu: 0.0.40
codegen_flags: <defaults>
</compile_context>

<pallas_src>
import functools

import jax
import jax.numpy as jnp
from jax.experimental import pallas as pl
from jax.experimental.pallas import tpu as pltpu

_LP = 8  # interior column offset inside the halo scratch (sublane-tile aligned)


# ---------------------------------------------------------------------------
# Pallas kernel: one grid step == one batch element, everything fused.
# ---------------------------------------------------------------------------
def _dsc_kernel(*refs, stride, use_se):
    if use_se:
        (x_ref, w1_ref, b1_ref, dw_ref, b2_ref, w2_ref,
         sw1_ref, sb1_ref, sw2_ref, sb2_ref, o_ref, y_ref) = refs
    else:
        (x_ref, w1_ref, b1_ref, dw_ref, b2_ref, w2_ref, o_ref, y_ref) = refs
        sw1_ref = sb1_ref = sw2_ref = sb2_ref = None

    H, W, Cin = x_ref.shape                 # unpadded per-image tile
    Cmid = w1_ref.shape[1]
    Cout = w2_ref.shape[1]
    Ho = (H - 1) // stride + 1              # 3x3 conv, padding=1
    Wo = (W - 1) // stride + 1

    # Zero the halo scratch every step (cheap; also keeps the kernel correct
    # when the "parallel" batch axis is split across TensorCores, since each
    # core owns a private scratch and no step-0 init can be relied on).
    y_ref[...] = jnp.zeros_like(y_ref)

    # ---- pointwise1 (1x1 conv; BN1 scale folded into w1) + bias + ReLU -------
    # Computed on the interior rows only; written into the scratch interior,
    # the halo stays exactly zero for the depthwise padding.
    x2d = x_ref[...].reshape(H * W, Cin)                      # bf16; W % 8 == 0 -> free reshape
    y2d = jnp.dot(x2d, w1_ref[...], preferred_element_type=jnp.float32)
    y2d = jnp.maximum(y2d + b1_ref[...], 0.0)
    y_ref[1:H + 1, _LP:_LP + W, :] = y2d.reshape(H, W, Cmid)  # sublane-aligned store

    # ---- depthwise 3x3 (BN2 scale folded into taps), computed at stride 1 ----
    y = y_ref[...]                            # (H+2, W_pad, Cmid) f32
    dw = dw_ref[...]                          # (9, Cmid) f32, loaded once
    acc = None
    for kw in range(3):
        # only 3 sublane-offset slabs (kw), the kh shifts are cheap major-axis slices
        col = y[:, _LP - 1 + kw:_LP - 1 + kw + W, :]          # (H+2, W, Cmid)
        for kh in range(3):
            k = kh * 3 + kw
            term = col[kh:kh + H, :, :] * dw[k:k + 1, :]
            acc = term if acc is None else acc + term

    if stride != 1:
        # one subsample at the end instead of 9 strided slices
        acc = acc[::stride, ::stride, :]

    # ---- folded BN2 bias + ReLU ----
    z = jnp.maximum(acc + b2_ref[...], 0.0)                   # (Ho, Wo, Cmid)
    z2d = z.reshape(Ho * Wo, Cmid)

    # ---- optional SqueezeExcite ----
    if use_se:
        pooled = jnp.mean(z2d, axis=0, keepdims=True)         # (1, Cmid)
        h = jnp.dot(pooled, sw1_ref[...],
                    preferred_element_type=jnp.float32) + sb1_ref[...]
        h = jnp.maximum(h, 0.0)                               # ReLU
        g = jnp.dot(h, sw2_ref[...],
                    preferred_element_type=jnp.float32) + sb2_ref[...]
        g = jnp.clip(g * (1.0 / 6.0) + 0.5, 0.0, 1.0)         # Hardsigmoid
        z2d = z2d * g

    # ---- pointwise2 (1x1 conv, no bias) ----
    out = jnp.dot(z2d.astype(jnp.bfloat16), w2_ref[...],
                  preferred_element_type=jnp.float32)
    o_ref[...] = out.reshape(Ho, Wo, Cout).astype(o_ref.dtype)


# ---------------------------------------------------------------------------
# Parameter folding shared by the kernel wrapper and the reference.
# ---------------------------------------------------------------------------
def _fold_bn(gamma, beta, mean, var, eps=1e-5):
    scale = gamma / jnp.sqrt(var + eps)
    return scale, beta - mean * scale


def _prepare_params(params, use_se):
    Cmid = params["pw1_w"].shape[0]
    s1, b1 = _fold_bn(params["bn1_g"], params["bn1_b"],
                      params["bn1_m"], params["bn1_v"])
    s2, b2 = _fold_bn(params["bn2_g"], params["bn2_b"],
                      params["bn2_m"], params["bn2_v"])

    w1 = jnp.transpose(params["pw1_w"][:, :, 0, 0], (1, 0)) * s1[None, :]       # (Cin, Cmid)
    dw9 = (jnp.transpose(params["dw_w"][:, 0], (1, 2, 0)).reshape(9, Cmid)
           * s2[None, :])                                                       # (9, Cmid)
    w2 = jnp.transpose(params["pw2_w"][:, :, 0, 0], (1, 0))                     # (Cmid, Cout)

    prep = {
        "w1": w1.astype(jnp.bfloat16),
        "b1": b1.reshape(1, Cmid).astype(jnp.float32),
        "dw9": dw9.astype(jnp.float32),
        "b2": b2.reshape(1, Cmid).astype(jnp.float32),
        "w2": w2.astype(jnp.bfloat16),
    }
    if use_se:
        Cred = params["se_w1"].shape[0]
        prep["sw1"] = jnp.transpose(params["se_w1"][:, :, 0, 0], (1, 0)).astype(jnp.float32)
        prep["sb1"] = params["se_b1"].reshape(1, Cred).astype(jnp.float32)
        prep["sw2"] = jnp.transpose(params["se_w2"][:, :, 0, 0], (1, 0)).astype(jnp.float32)
        prep["sb2"] = params["se_b2"].reshape(1, Cmid).astype(jnp.float32)
    return prep


# ---------------------------------------------------------------------------
# Wrapper: NCHW<->NHWC conversion, pallas_call plumbing.
# ---------------------------------------------------------------------------
def depthwise_separable_conv(x_nchw, params, *, stride=1, use_se=False):
    N, Cin, H, W = x_nchw.shape
    Cmid = params["pw1_w"].shape[0]
    Cout = params["pw2_w"].shape[0]
    Ho = (H - 1) // stride + 1
    Wo = (W - 1) // stride + 1

    # NCHW -> NHWC, bf16 activations for the MXU (halves input DMA); no HBM pad.
    x = jnp.transpose(x_nchw, (0, 2, 3, 1)).astype(jnp.bfloat16)

    prep = _prepare_params(params, use_se)

    # Halo scratch: interior columns at [_LP, _LP+W), halos at _LP-1 and _LP+W
    # (sublane-tile aligned interior), halo rows at 0 and H+1.
    Hp = H + 2
    W_pad = W + _LP + 1

    full = lambda n: (0, 0)
    in_specs = [
        pl.BlockSpec((None, H, W, Cin), lambda n: (n, 0, 0, 0)),
        pl.BlockSpec((Cin, Cmid), full),
        pl.BlockSpec((1, Cmid), full),
        pl.BlockSpec((9, Cmid), full),
        pl.BlockSpec((1, Cmid), full),
        pl.BlockSpec((Cmid, Cout), full),
    ]
    args = [x, prep["w1"], prep["b1"], prep["dw9"], prep["b2"], prep["w2"]]

    if use_se:
        Cred = prep["sw1"].shape[1]
        in_specs += [
            pl.BlockSpec((Cmid, Cred), full),
            pl.BlockSpec((1, Cred), full),
            pl.BlockSpec((Cred, Cmid), full),
            pl.BlockSpec((1, Cmid), full),
        ]
        args += [prep["sw1"], prep["sb1"], prep["sw2"], prep["sb2"]]

    # Explicit scoped-VMEM limit sized from the per-step working set.
    weight_bytes = sum(int(a.size) * a.dtype.itemsize for a in args[1:])
    x_blk = H * W * Cin * 2
    o_blk = Ho * Wo * Cout * 4
    scratch_b = Hp * W_pad * Cmid * 4
    interm = 8 * H * W * Cmid * 4                      # y/acc/slab temporaries headroom
    est = 2 * (x_blk + o_blk + weight_bytes) + scratch_b + interm
    vmem_limit = int(min(48 * 2 ** 20, max(32 * 2 ** 20, 2 * est)))

    out_nhwc = pl.pallas_call(
        functools.partial(_dsc_kernel, stride=stride, use_se=use_se),
        out_shape=jax.ShapeDtypeStruct((N, Ho, Wo, Cout), jnp.float32),
        grid=(N,),
        in_specs=in_specs,
        out_specs=pl.BlockSpec((None, Ho, Wo, Cout), lambda n: (n, 0, 0, 0)),
        scratch_shapes=[pltpu.VMEM((Hp, W_pad, Cmid), jnp.float32)],
        compiler_params=pltpu.CompilerParams(
            dimension_semantics=("parallel",),
            vmem_limit_bytes=vmem_limit),
    )(*args)

    return jnp.transpose(out_nhwc, (0, 3, 1, 2))       # back to NCHW


# ---------------------------------------------------------------------------
# Pure-JAX reference (same math, matched matmul operand precision: bf16 in,
# f32 accumulation) for the correctness check.
# ---------------------------------------------------------------------------
def reference(x_nchw, params, *, stride=1, use_se=False):
    prep = _prepare_params(params, use_se)
    Cmid = prep["w1"].shape[1]
    x = jnp.transpose(x_nchw, (0, 2, 3, 1)).astype(jnp.bfloat16)
    N, H, W, _ = x.shape
    Ho = (H - 1) // stride + 1
    Wo = (W - 1) // stride + 1

    y = jnp.einsum("nhwc,cd->nhwd", x, prep["w1"],
                   preferred_element_type=jnp.float32)
    y = jnp.maximum(y + prep["b1"], 0.0)

    dw = prep["dw9"].reshape(3, 3, Cmid)
    yp = jnp.pad(y, ((0, 0), (1, 1), (1, 1), (0, 0)))
    acc = jnp.zeros((N, Ho, Wo, Cmid), jnp.float32)
    for kh in range(3):
        for kw in range(3):
            acc = acc + yp[:, kh:kh + (Ho - 1) * stride + 1:stride,
                           kw:kw + (Wo - 1) * stride + 1:stride, :] * dw[kh, kw]
    z = jnp.maximum(acc + prep["b2"], 0.0)

    if use_se:
        pooled = z.mean(axis=(1, 2), keepdims=True)
        h = jnp.maximum(jnp.einsum("nhwc,cd->nhwd", pooled, prep["sw1"],
                                   preferred_element_type=jnp.float32) + prep["sb1"], 0.0)
        g = jnp.einsum("nhwc,cd->nhwd", h, prep["sw2"],
                       preferred_element_type=jnp.float32) + prep["sb2"]
        g = jnp.clip(g / 6.0 + 0.5, 0.0, 1.0)
        z = z * g

    out = jnp.einsum("nhwc,cd->nhwd", z.astype(jnp.bfloat16), prep["w2"],
                     preferred_element_type=jnp.float32)
    return jnp.transpose(out, (0, 3, 1, 2))


# ---------------------------------------------------------------------------
def make_params(key, Cin, Cmid, Cout, reduction=4):
    ks = jax.random.split(key, 12)
    Cred = Cmid // reduction
    u = lambda k, shape, s=0.5: jax.random.uniform(k, shape, jnp.float32, -s, s)
    return {
        "pw1_w": u(ks[0], (Cmid, Cin, 1, 1)),
        "dw_w":  u(ks[1], (Cmid, 1, 3, 3)),
        "pw2_w": u(ks[2], (Cout, Cmid, 1, 1)),
        "bn1_g": 1.0 + 0.1 * u(ks[3], (Cmid,)),
        "bn1_b": 0.1 * u(ks[4], (Cmid,)),
        "bn1_m": 0.1 * u(ks[5], (Cmid,)),
        "bn1_v": 1.0 + 0.1 * jnp.abs(u(ks[6], (Cmid,))),
        "bn2_g": 1.0 + 0.1 * u(ks[7], (Cmid,)),
        "bn2_b": 0.1 * u(ks[8], (Cmid,)),
        "bn2_m": 0.1 * u(ks[9], (Cmid,)),
        "bn2_v": 1.0 + 0.1 * jnp.abs(u(ks[10], (Cmid,))),
        "se_w1": u(ks[11], (Cred, Cmid, 1, 1)),
        "se_b1": jnp.linspace(-0.1, 0.1, Cred, dtype=jnp.float32),
        "se_b2": jnp.linspace(-0.2, 0.2, Cmid, dtype=jnp.float32),
        "se_w2": u(ks[0], (Cmid, Cred, 1, 1)) * 0.3,
    }


if __name__ == "__main__":
    key = jax.random.PRNGKey(0)
    k_x, k_p = jax.random.split(key)

    N, Cin, Cmid, Cout, H, W = 2, 4, 8, 8, 16, 16
    x = jax.random.normal(k_x, (N, Cin, H, W), jnp.float32)
    params = make_params(k_p, Cin, Cmid, Cout)

    ok = True
    for use_se in (False, True):
        out = jax.block_until_ready(
            depthwise_separable_conv(x, params, stride=1, use_se=use_se))
        ref = jax.block_until_ready(reference(x, params, stride=1, use_se=use_se))
        assert out.shape == (N, Cout, H, W), out.shape
        if not jnp.allclose(out, ref, rtol=2e-3, atol=2e-3):
            ok = False

    if ok:
        print("KERNEL_OK")
</pallas_src>

<mosaic_0001>
module attributes {stable_mosaic.version = 11 : i64} {
  func.func @_dsc_kernel(%arg0: i32, %arg1: memref<1x16x16x4xbf16, #tpu.memory_space<vmem>>, %arg2: memref<4x8xbf16, #tpu.memory_space<vmem>>, %arg3: memref<1x8xf32, #tpu.memory_space<vmem>>, %arg4: memref<9x8xf32, #tpu.memory_space<vmem>>, %arg5: memref<1x8xf32, #tpu.memory_space<vmem>>, %arg6: memref<8x8xbf16, #tpu.memory_space<vmem>>, %arg7: memref<1x16x16x8xf32, #tpu.memory_space<vmem>>, %arg8: memref<18x25x8xf32, #tpu.memory_space<vmem>>) attributes {dimension_semantics = [#tpu.dimension_semantics<parallel>], iteration_bounds = array<i64: 2>, scalar_prefetch = 0 : i64, scratch_operands = 1 : i64, tpu.core_type = #tpu.core_type<tc>, window_params = [{transform_indices = @transform_0, window_bounds = array<i64: 1, 16, 16, 4>}, {pipeline_mode = #tpu.pipeline_mode<synchronous>, transform_indices = @transform_1, window_bounds = array<i64: 4, 8>}, {pipeline_mode = #tpu.pipeline_mode<synchronous>, transform_indices = @transform_2, window_bounds = array<i64: 1, 8>}, {pipeline_mode = #tpu.pipeline_mode<synchronous>, transform_indices = @transform_3, window_bounds = array<i64: 9, 8>}, {pipeline_mode = #tpu.pipeline_mode<synchronous>, transform_indices = @transform_4, window_bounds = array<i64: 1, 8>}, {pipeline_mode = #tpu.pipeline_mode<synchronous>, transform_indices = @transform_5, window_bounds = array<i64: 8, 8>}, {transform_indices = @transform_6, window_bounds = array<i64: 1, 16, 16, 8>}]} {
    %cst = arith.constant 0.000000e+00 : f32
    %0 = vector.broadcast %cst : f32 to vector<18x25x8xf32>
    %c0 = arith.constant 0 : index
    %c0_0 = arith.constant 0 : index
    %c0_1 = arith.constant 0 : index
    %1 = vector.load %arg8[%c0, %c0_0, %c0_1] : memref<18x25x8xf32, #tpu.memory_space<vmem>>, vector<18x25x8xf32>
    tpu.vector_store %arg8[%c0, %c0_0, %c0_1], %0 {strides = array<i32>} : memref<18x25x8xf32, #tpu.memory_space<vmem>>, vector<18x25x8xf32>,
    %c0_2 = arith.constant 0 : index
    %c0_3 = arith.constant 0 : index
    %c0_4 = arith.constant 0 : index
    %c0_5 = arith.constant 0 : index
    %2 = vector.load %arg1[%c0_2, %c0_3, %c0_4, %c0_5] : memref<1x16x16x4xbf16, #tpu.memory_space<vmem>>, vector<1x16x16x4xbf16>
    %3 = vector.shape_cast %2 : vector<1x16x16x4xbf16> to vector<16x16x4xbf16>
    %4 = vector.shape_cast %3 : vector<16x16x4xbf16> to vector<256x4xbf16>
    %c0_6 = arith.constant 0 : index
    %c0_7 = arith.constant 0 : index
    %5 = vector.load %arg2[%c0_6, %c0_7] : memref<4x8xbf16, #tpu.memory_space<vmem>>, vector<4x8xbf16>
    %cst_8 = arith.constant dense<0.000000e+00> : vector<256x8xf32>
    %6 = tpu.matmul %4, %5, %cst_8 {dimension_numbers = #tpu.dot_dimension_numbers<[1], [0], [0], [1], [0, 0, 1, 1], [], []>} : vector<256x4xbf16>, vector<4x8xbf16>, vector<256x8xf32> -> vector<256x8xf32>
    %c0_9 = arith.constant 0 : index
    %c0_10 = arith.constant 0 : index
    %7 = vector.load %arg3[%c0_9, %c0_10] : memref<1x8xf32, #tpu.memory_space<vmem>>, vector<1x8xf32>
    %8 = vector.broadcast %7 : vector<1x8xf32> to vector<256x8xf32>
    %9 = arith.addf %6, %8 : vector<256x8xf32>
    %cst_11 = arith.constant 0.000000e+00 : f32
    %10 = vector.broadcast %cst_11 : f32 to vector<256x8xf32>
    %11 = arith.maximumf %9, %10 : vector<256x8xf32>
    %12 = vector.shape_cast %11 : vector<256x8xf32> to vector<16x16x8xf32>
    %c1 = arith.constant 1 : index
    %c8 = arith.constant 8 : index
    %c0_12 = arith.constant 0 : index
    %13 = vector.load %arg8[%c1, %c8, %c0_12] : memref<18x25x8xf32, #tpu.memory_space<vmem>>, vector<16x16x8xf32>
    tpu.vector_store %arg8[%c1, %c8, %c0_12], %12 {strides = array<i32>} : memref<18x25x8xf32, #tpu.memory_space<vmem>>, vector<16x16x8xf32>,
    %c0_13 = arith.constant 0 : index
    %c0_14 = arith.constant 0 : index
    %c0_15 = arith.constant 0 : index
    %14 = vector.load %arg8[%c0_13, %c0_14, %c0_15] : memref<18x25x8xf32, #tpu.memory_space<vmem>>, vector<18x25x8xf32>
    %c0_16 = arith.constant 0 : index
    %c0_17 = arith.constant 0 : index
    %15 = vector.load %arg4[%c0_16, %c0_17] : memref<9x8xf32, #tpu.memory_space<vmem>>, vector<9x8xf32>
    %16 = vector.extract_strided_slice %14 {offsets = [0, 7, 0], sizes = [18, 16, 8], strides = [1, 1, 1]} : vector<18x25x8xf32> to vector<18x16x8xf32>
    %17 = vector.extract_strided_slice %16 {offsets = [0, 0, 0], sizes = [16, 16, 8], strides = [1, 1, 1]} : vector<18x16x8xf32> to vector<16x16x8xf32>
    %18 = vector.extract_strided_slice %15 {offsets = [0, 0], sizes = [1, 8], strides = [1, 1]} : vector<9x8xf32> to vector<1x8xf32>
    %19 = vector.shape_cast %18 : vector<1x8xf32> to vector<1x1x8xf32>
    %20 = vector.broadcast %19 : vector<1x1x8xf32> to vector<16x16x8xf32>
    %21 = arith.mulf %17, %20 : vector<16x16x8xf32>
    %22 = vector.extract_strided_slice %16 {offsets = [1, 0, 0], sizes = [16, 16, 8], strides = [1, 1, 1]} : vector<18x16x8xf32> to vector<16x16x8xf32>
    %23 = vector.extract_strided_slice %15 {offsets = [3, 0], sizes = [1, 8], strides = [1, 1]} : vector<9x8xf32> to vector<1x8xf32>
    %24 = vector.shape_cast %23 : vector<1x8xf32> to vector<1x1x8xf32>
    %25 = vector.broadcast %24 : vector<1x1x8xf32> to vector<16x16x8xf32>
    %26 = arith.mulf %22, %25 : vector<16x16x8xf32>
    %27 = arith.addf %21, %26 : vector<16x16x8xf32>
    %28 = vector.extract_strided_slice %16 {offsets = [2, 0, 0], sizes = [16, 16, 8], strides = [1, 1, 1]} : vector<18x16x8xf32> to vector<16x16x8xf32>
    %29 = vector.extract_strided_slice %15 {offsets = [6, 0], sizes = [1, 8], strides = [1, 1]} : vector<9x8xf32> to vector<1x8xf32>
    %30 = vector.shape_cast %29 : vector<1x8xf32> to vector<1x1x8xf32>
    %31 = vector.broadcast %30 : vector<1x1x8xf32> to vector<16x16x8xf32>
    %32 = arith.mulf %28, %31 : vector<16x16x8xf32>
    %33 = arith.addf %27, %32 : vector<16x16x8xf32>
    %34 = vector.extract_strided_slice %14 {offsets = [0, 8, 0], sizes = [18, 16, 8], strides = [1, 1, 1]} : vector<18x25x8xf32> to vector<18x16x8xf32>
    %35 = vector.extract_strided_slice %34 {offsets = [0, 0, 0], sizes = [16, 16, 8], strides = [1, 1, 1]} : vector<18x16x8xf32> to vector<16x16x8xf32>
    %36 = vector.extract_strided_slice %15 {offsets = [1, 0], sizes = [1, 8], strides = [1, 1]} : vector<9x8xf32> to vector<1x8xf32>
    %37 = vector.shape_cast %36 : vector<1x8xf32> to vector<1x1x8xf32>
    %38 = vector.broadcast %37 : vector<1x1x8xf32> to vector<16x16x8xf32>
    %39 = arith.mulf %35, %38 : vector<16x16x8xf32>
    %40 = arith.addf %33, %39 : vector<16x16x8xf32>
    %41 = vector.extract_strided_slice %34 {offsets = [1, 0, 0], sizes = [16, 16, 8], strides = [1, 1, 1]} : vector<18x16x8xf32> to vector<16x16x8xf32>
    %42 = vector.extract_strided_slice %15 {offsets = [4, 0], sizes = [1, 8], strides = [1, 1]} : vector<9x8xf32> to vector<1x8xf32>
    %43 = vector.shape_cast %42 : vector<1x8xf32> to vector<1x1x8xf32>
    %44 = vector.broadcast %43 : vector<1x1x8xf32> to vector<16x16x8xf32>
    %45 = arith.mulf %41, %44 : vector<16x16x8xf32>
    %46 = arith.addf %40, %45 : vector<16x16x8xf32>
    %47 = vector.extract_strided_slice %34 {offsets = [2, 0, 0], sizes = [16, 16, 8], strides = [1, 1, 1]} : vector<18x16x8xf32> to vector<16x16x8xf32>
    %48 = vector.extract_strided_slice %15 {offsets = [7, 0], sizes = [1, 8], strides = [1, 1]} : vector<9x8xf32> to vector<1x8xf32>
    %49 = vector.shape_cast %48 : vector<1x8xf32> to vector<1x1x8xf32>
    %50 = vector.broadcast %49 : vector<1x1x8xf32> to vector<16x16x8xf32>
    %51 = arith.mulf %47, %50 : vector<16x16x8xf32>
    %52 = arith.addf %46, %51 : vector<16x16x8xf32>
    %53 = vector.extract_strided_slice %14 {offsets = [0, 9, 0], sizes = [18, 16, 8], strides = [1, 1, 1]} : vector<18x25x8xf32> to vector<18x16x8xf32>
    %54 = vector.extract_strided_slice %53 {offsets = [0, 0, 0], sizes = [16, 16, 8], strides = [1, 1, 1]} : vector<18x16x8xf32> to vector<16x16x8xf32>
    %55 = vector.extract_strided_slice %15 {offsets = [2, 0], sizes = [1, 8], strides = [1, 1]} : vector<9x8xf32> to vector<1x8xf32>
    %56 = vector.shape_cast %55 : vector<1x8xf32> to vector<1x1x8xf32>
    %57 = vector.broadcast %56 : vector<1x1x8xf32> to vector<16x16x8xf32>
    %58 = arith.mulf %54, %57 : vector<16x16x8xf32>
    %59 = arith.addf %52, %58 : vector<16x16x8xf32>
    %60 = vector.extract_strided_slice %53 {offsets = [1, 0, 0], sizes = [16, 16, 8], strides = [1, 1, 1]} : vector<18x16x8xf32> to vector<16x16x8xf32>
    %61 = vector.extract_strided_slice %15 {offsets = [5, 0], sizes = [1, 8], strides = [1, 1]} : vector<9x8xf32> to vector<1x8xf32>
    %62 = vector.shape_cast %61 : vector<1x8xf32> to vector<1x1x8xf32>
    %63 = vector.broadcast %62 : vector<1x1x8xf32> to vector<16x16x8xf32>
    %64 = arith.mulf %60, %63 : vector<16x16x8xf32>
    %65 = arith.addf %59, %64 : vector<16x16x8xf32>
    %66 = vector.extract_strided_slice %53 {offsets = [2, 0, 0], sizes = [16, 16, 8], strides = [1, 1, 1]} : vector<18x16x8xf32> to vector<16x16x8xf32>
    %67 = vector.extract_strided_slice %15 {offsets = [8, 0], sizes = [1, 8], strides = [1, 1]} : vector<9x8xf32> to vector<1x8xf32>
    %68 = vector.shape_cast %67 : vector<1x8xf32> to vector<1x1x8xf32>
    %69 = vector.broadcast %68 : vector<1x1x8xf32> to vector<16x16x8xf32>
    %70 = arith.mulf %66, %69 : vector<16x16x8xf32>
    %71 = arith.addf %65, %70 : vector<16x16x8xf32>
    %c0_18 = arith.constant 0 : index
    %c0_19 = arith.constant 0 : index
    %72 = vector.load %arg5[%c0_18, %c0_19] : memref<1x8xf32, #tpu.memory_space<vmem>>, vector<1x8xf32>
    %73 = vector.shape_cast %72 : vector<1x8xf32> to vector<1x1x8xf32>
    %74 = vector.broadcast %73 : vector<1x1x8xf32> to vector<16x16x8xf32>
    %75 = arith.addf %71, %74 : vector<16x16x8xf32>
    %cst_20 = arith.constant 0.000000e+00 : f32
    %76 = vector.broadcast %cst_20 : f32 to vector<16x16x8xf32>
    %77 = arith.maximumf %75, %76 : vector<16x16x8xf32>
    %78 = vector.shape_cast %77 : vector<16x16x8xf32> to vector<256x8xf32>
    %79 = arith.truncf %78 : vector<256x8xf32> to vector<256x8xbf16>
    %c0_21 = arith.constant 0 : index
    %c0_22 = arith.constant 0 : index
    %80 = vector.load %arg6[%c0_21, %c0_22] : memref<8x8xbf16, #tpu.memory_space<vmem>>, vector<8x8xbf16>
    %cst_23 = arith.constant dense<0.000000e+00> : vector<256x8xf32>
    %81 = tpu.matmul %79, %80, %cst_23 {dimension_numbers = #tpu.dot_dimension_numbers<[1], [0], [0], [1], [0, 0, 1, 1], [], []>} : vector<256x8xbf16>, vector<8x8xbf16>, vector<256x8xf32> -> vector<256x8xf32>
    %82 = vector.shape_cast %81 : vector<256x8xf32> to vector<16x16x8xf32>
    %c0_24 = arith.constant 0 : index
    %c0_25 = arith.constant 0 : index
    %c0_26 = arith.constant 0 : index
    %c0_27 = arith.constant 0 : index
    %83 = vector.load %arg7[%c0_24, %c0_25, %c0_26, %c0_27] : memref<1x16x16x8xf32, #tpu.memory_space<vmem>>, vector<1x16x16x8xf32>
    %84 = vector.shape_cast %83 : vector<1x16x16x8xf32> to vector<16x16x8xf32>
    %85 = vector.shape_cast %82 : vector<16x16x8xf32> to vector<1x16x16x8xf32>
    tpu.vector_store %arg7[%c0_24, %c0_25, %c0_26, %c0_27], %85 {strides = array<i32>} : memref<1x16x16x8xf32, #tpu.memory_space<vmem>>, vector<1x16x16x8xf32>,
    return
  }
  func.func @transform_0(%arg0: i32) -> (i32, i32, i32, i32) {
    %c0_i32 = arith.constant 0 : i32
    %c0_i32_0 = arith.constant 0 : i32
    %c0_i32_1 = arith.constant 0 : i32
    %c0_i32_2 = arith.constant 0 : i32
    return %arg0, %c0_i32, %c0_i32_0, %c0_i32_1 : i32, i32, i32, i32
  }
  func.func @transform_1(%arg0: i32) -> (i32, i32) {
    %c0_i32 = arith.constant 0 : i32
    %c0_i32_0 = arith.constant 0 : i32
    %c0_i32_1 = arith.constant 0 : i32
    return %c0_i32, %c0_i32_0 : i32, i32
  }
  func.func @transform_2(%arg0: i32) -> (i32, i32) {
    %c0_i32 = arith.constant 0 : i32
    %c0_i32_0 = arith.constant 0 : i32
    %c0_i32_1 = arith.constant 0 : i32
    return %c0_i32, %c0_i32_0 : i32, i32
  }
  func.func @transform_3(%arg0: i32) -> (i32, i32) {
    %c0_i32 = arith.constant 0 : i32
    %c0_i32_0 = arith.constant 0 : i32
    %c0_i32_1 = arith.constant 0 : i32
    return %c0_i32, %c0_i32_0 : i32, i32
  }
  func.func @transform_4(%arg0: i32) -> (i32, i32) {
    %c0_i32 = arith.constant 0 : i32
    %c0_i32_0 = arith.constant 0 : i32
    %c0_i32_1 = arith.constant 0 : i32
    return %c0_i32, %c0_i32_0 : i32, i32
  }
  func.func @transform_5(%arg0: i32) -> (i32, i32) {
    %c0_i32 = arith.constant 0 : i32
    %c0_i32_0 = arith.constant 0 : i32
    %c0_i32_1 = arith.constant 0 : i32
    return %c0_i32, %c0_i32_0 : i32, i32
  }
  func.func @transform_6(%arg0: i32) -> (i32, i32, i32, i32) {
    %c0_i32 = arith.constant 0 : i32
    %c0_i32_0 = arith.constant 0 : i32
    %c0_i32_1 = arith.constant 0 : i32
    %c0_i32_2 = arith.constant 0 : i32
    return %arg0, %c0_i32, %c0_i32_0, %c0_i32_1 : i32, i32, i32, i32
  }
}

</mosaic_0001>

<bundles_post_ra>
// kernel: tpu_custom_call.1
= control target key start
LH: loop header
LB: loop body
LE: loop exit
PB: predicated region body
PF: predicated region fallthrough
CT: control target
= control target key end

     0   :  { %s3343_s21 = smov 0   ;;  %s4944_s0 = inlined_call_operand.vmem [shape: bf16[2,16,16,4], index: 0, kind: input, shape index: {}]   ;;  %s4945_s1 = inlined_call_operand.vmem [shape: bf16[4,8], index: 1, kind: input, shape index: {}]   ;;  %s4946_s2 = inlined_call_operand.vmem [shape: f32[1,8], index: 2, kind: input, shape index: {}]   ;;  %s4947_s3 = inlined_call_operand.vmem [shape: f32[9,8], index: 3, kind: input, shape index: {}]   ;;  %s4948_s4 = inlined_call_operand.vmem [shape: f32[1,8], index: 4, kind: input, shape index: {}]   ;;  %s4949_s5 = inlined_call_operand.vmem [shape: bf16[8,8], index: 5, kind: input, shape index: {}]   ;;  %s4950_s6 = inlined_call_operand.vmem [shape: f32[2,16,16,8], index: 6, kind: output, shape index: {}]  }
   0x1 LB: > { %s3099_s22 = sadd.s32 4294967295, %s3305_s21   ;;  %p3103_p0 = scmp.ge.s32.totalorder %s3305_s21, 1  ;;  %s3305_s21 = sphi %s3343_s21, %s16_s21  }
   0x2   : > { %p212_p1 = scmp.lt.s32.totalorder %s3305_s21, 3 }
   0x4   : > { %p213_p2 = pnand %p3103_p0, %p212_p1 }
   0x6   : > { %216 = sbr.rel (%p213_p2) target bundleno = 801 (0x321), region = 44 }
   0xd   : > { %v359_v0 = vld [vmem:[%s4945_s1] sm:$0x3]  ;;  %vm496_vm0 = vcmask 1041408   ;;  %p242_p3 = scmp.lt.s32.totalorder %s3099_s22, 1  ;;  %vm253_vm1 = vcmask 64512   ;;  %v3307_v2 = vmov 0.0   ;;  %v800_v21 = vlaneseq }
   0xe   : > { %3265 = vmatprep.subr.msk.bf16.mxu0 %vm496_vm0, %v359_v0  ;;  %v498_v1 = vsel %vm496_vm0, %v359_v0, 0  ;;  %264 = vst.msk [vmem:[#allocation2 + $0x48] sm:$0xff] %vm253_vm1, %v3307_v2  ;;  %254 = vst.msk [vmem:[#allocation2] sm:$0xff] %vm253_vm1, %v3307_v2  ;;  %vm447_vm2 = vcmask 31744   ;;  %vm257_vm3 = vcmask 57344   ;;  %vm2847_vm4 = vcmask 1043456  }
   0xf   : > { %3198 = vmatpush3.bf16.msra.mxu0 %v498_v1  ;;  %s4997_s22 = smov (!%p242_p3, %s3099_s22), 1  ;;  %255 = vst.msk [vmem:[#allocation2 + $0x8] sm:$0xff] %vm253_vm1, %v3307_v2  ;;  %256 = vst.msk [vmem:[#allocation2 + $0x10] sm:$0xff] %vm253_vm1, %v3307_v2  ;;  %v2798_v19 = vld [vmem:[%s4949_s5] sm:$0xf]  ;;  %v801_v22 = vshrl.u32 %v800_v21, 7 }
  0x10   : > { %259 = vst.msk [vmem:[#allocation2 + $0x20] sm:$0xff] %vm253_vm1, %v3307_v2  ;;  %260 = vst.msk [vmem:[#allocation2 + $0x28] sm:$0xff] %vm253_vm1, %v3307_v2  ;;  %s3161_s25 = sshll.u32 %s4997_s22, 7  ;;  %3266 = vmatprep.subr.msk.bf16.mxu1 %vm2847_vm4, %v2798_v19  ;;  %v2849_v20 = vsel %vm2847_vm4, %v2798_v19, 0  ;;  %v798_v25 = vld [vmem:[%s4947_s3] sm:$0xff]  ;;  %vm1120_vm5 = vcmask 1046528  }
  0x11   : > { %261 = vst.msk [vmem:[#allocation2 + $0x30] sm:$0xff] %vm253_vm1, %v3307_v2  ;;  %263 = vst.msk [vmem:[#allocation2 + $0x40] sm:$0xff] %vm253_vm1, %v3307_v2  ;;  %s3468_s28 = scalar_lea.vmem %s4944_s0, %s3161_s25  ;;  %3232 = vmatpush3.bf16.msra.mxu1 %v2849_v20  ;;  %v802_v23 = vsub.s32 0, %v801_v22  ;;  %v854_v24 = vsub.s32 3, %v801_v22  ;;  %v954_v28 = vsub.s32 6, %v801_v22  ;;  %v1054_v29 = vsub.s32 1, %v801_v22 }
  0x12   : > { %265 = vst.msk [vmem:[#allocation2 + $0x50] sm:$0xff] %vm253_vm1, %v3307_v2  ;;  %267 = vst.msk [vmem:[#allocation2 + $0x60] sm:$0xff] %vm253_vm1, %v3307_v2  ;;  %v3276_v3 = vld [vmem:[%s3468_s28] sm:$0xff]   ;;  %v3277_v4 = vld [vmem:[%s3468_s28 + $0x8] sm:$0xff]   ;;  %v1691_v38 = vsub.s32 2, %v801_v22  ;;  %v1267_v43 = vsub.s32 4, %v801_v22 }
  0x13   : > { %268 = vst.msk [vmem:[#allocation2 + $0x68] sm:$0xff] %vm253_vm1, %v3307_v2  ;;  %269 = vst.msk [vmem:[#allocation2 + $0x70] sm:$0xff] %vm253_vm1, %v3307_v2  ;;  %3199 = vmatprep.mubr.msk.bf16.mxu0 %vm447_vm2, %v3276_v3  ;;  %v3278_v5 = vld [vmem:[%s3468_s28 + $0x10] sm:$0xff]   ;;  %v3279_v6 = vld [vmem:[%s3468_s28 + $0x18] sm:$0xff]   ;;  %v3544_v26 = vrot.slane %v798_v25, %v802_v23  ;;  %v3546_v27 = vrot.slane %v798_v25, %v854_v24  ;;  %v3550_v34 = vrot.slane %v798_v25, %v954_v28  ;;  %vm1789_vm6 = vcmask 1045504   ;;  %s3162_s23 = sshll.u32 %s4997_s22, 8 }
  0x14   : > { %271 = vst.msk [vmem:[#allocation2 + $0x80] sm:$0xff] %vm253_vm1, %v3307_v2  ;;  %272 = vst.msk [vmem:[#allocation2 + $0x88] sm:$0xff] %vm253_vm1, %v3307_v2  ;;  %3200 = vmatmul.mubr.msk.bf16.vlgmr.msra.gmra.mrb[0].mxu0 %vm447_vm2, %v3277_v4  ;;  %v3280_v7 = vld [vmem:[%s3468_s28 + $0x20] sm:$0xff]   ;;  %v3281_v8 = vld [vmem:[%s3468_s28 + $0x28] sm:$0xff]   ;;  %v3552_v35 = vrot.slane %v798_v25, %v1054_v29  ;;  %v1479_v45 = vsub.s32 7, %v801_v22  ;;  %v1968_v46 = vsub.s32 5, %v801_v22  ;;  %v3559_v49 = vrot.slane %v798_v25, %v1691_v38  ;;  %s4665_s25 = scalar_lea.vmem %s4950_s6, %s3162_s23 }
  0x15   : > { %273 = vst.msk [vmem:[#allocation2 + $0x90] sm:$0xff] %vm253_vm1, %v3307_v2  ;;  %275 = vst.msk [vmem:[#allocation2 + $0xa0] sm:$0xff] %vm253_vm1, %v3307_v2  ;;  %3203 = vmatprep.mubr.msk.bf16.mxu0 %vm447_vm2, %v3278_v5  ;;  %v3282_v9 = vld [vmem:[%s3468_s28 + $0x30] sm:$0xff]   ;;  %v3283_v10 = vld [vmem:[%s3468_s28 + $0x38] sm:$0xff]   ;;  %v3564_v57 = vrot.slane %v798_v25, %v1267_v43  ;;  %vm2669_vm7 = vcmask 1040384  }
  0x16   : > { %276 = vst.msk [vmem:[#allocation2 + $0xa8] sm:$0xff] %vm253_vm1, %v3307_v2  ;;  %277 = vst.msk [vmem:[#allocation2 + $0xb0] sm:$0xff] %vm253_vm1, %v3307_v2  ;;  %v3284_v11 = vld [vmem:[%s3468_s28 + $0x40] sm:$0xff]   ;;  %v3285_v12 = vld [vmem:[%s3468_s28 + $0x48] sm:$0xff]   ;;  %v3569_v59 = vrot.slane %v798_v25, %v1479_v45  ;;  %v3573_v62 = vrot.slane %v798_v25, %v1968_v46 }
  0x17   : > { %279 = vst.msk [vmem:[#allocation2 + $0xc0] sm:$0xff] %vm253_vm1, %v3307_v2  ;;  %280 = vst.msk [vmem:[#allocation2 + $0xc8] sm:$0xff] %vm253_vm1, %v3307_v2  ;;  %v3286_v13 = vld [vmem:[%s3468_s28 + $0x50] sm:$0xff]   ;;  %v3287_v14 = vld [vmem:[%s3468_s28 + $0x58] sm:$0xff]  }
  0x18   : > { %281 = vst.msk [vmem:[#allocation2 + $0xd0] sm:$0xff] %vm253_vm1, %v3307_v2  ;;  %283 = vst.msk [vmem:[#allocation2 + $0xe0] sm:$0xff] %vm253_vm1, %v3307_v2  ;;  %v3288_v15 = vld [vmem:[%s3468_s28 + $0x60] sm:$0xff]   ;;  %v3289_v16 = vld [vmem:[%s3468_s28 + $0x68] sm:$0xff]  }
  0x19   : > { %284 = vst.msk [vmem:[#allocation2 + $0xe8] sm:$0xff] %vm253_vm1, %v3307_v2  ;;  %285 = vst.msk [vmem:[#allocation2 + $0xf0] sm:$0xff] %vm253_vm1, %v3307_v2  ;;  %v3290_v17 = vld [vmem:[%s3468_s28 + $0x70] sm:$0xff]   ;;  %v3291_v18 = vld [vmem:[%s3468_s28 + $0x78] sm:$0xff]  }
  0x1a   : > { %287 = vst.msk [vmem:[#allocation2 + $0x100] sm:$0xff] %vm253_vm1, %v3307_v2  ;;  %288 = vst.msk [vmem:[#allocation2 + $0x108] sm:$0xff] %vm253_vm1, %v3307_v2  ;;  %v726_v30 = vld [vmem:[#allocation2] sm:$0xff]  ;;  %v727_v36 = vld [vmem:[#allocation2 + $0x8] sm:$0xff] }
  0x1b   : > { %289 = vst.msk [vmem:[#allocation2 + $0x110] sm:$0xff] %vm253_vm1, %v3307_v2  ;;  %291 = vst.msk [vmem:[#allocation2 + $0x120] sm:$0xff] %vm253_vm1, %v3307_v2  ;;  %v730_v31 = vld [vmem:[#allocation2 + $0x20] sm:$0xff]  ;;  %v804_v32 = vmul.f32 %v3544_v26, %v726_v30  ;;  %v728_v39 = vld [vmem:[#allocation2 + $0x10] sm:$0xff]  ;;  %v1056_v42 = vmul.f32 %v3552_v35, %v727_v36  ;;  %v3576_v63 = vmul.f32 %v3544_v26, %v727_v36 }
  0x1c   : > { %292 = vst.msk [vmem:[#allocation2 + $0x128] sm:$0xff] %vm253_vm1, %v3307_v2  ;;  %293 = vst.msk [vmem:[#allocation2 + $0x130] sm:$0xff] %vm253_vm1, %v3307_v2  ;;  %3204 = vmatmul.mubr.msk.bf16.gmra.mrb[4].mxu0 %vm447_vm2, %v3279_v6  ;;  %v856_v33 = vmul.f32 %v3546_v27, %v730_v31  ;;  %v734_v37 = vld [vmem:[#allocation2 + $0x40] sm:$0xff]  ;;  %v3557_v48 = vmul.f32 %v3552_v35, %v728_v39  ;;  %v807_v55 = vmul.f32 %v3544_v26, %v730_v31  ;;  %v3586_v3 = vld [vmem:[%s4947_s3 + $0x8] ss:$0 sm:$0xff] }
  0x1d   : > { %295 = vst.msk [vmem:[#allocation2 + $0x140] sm:$0xff] %vm253_vm1, %v3307_v2  ;;  %296 = vst.msk [vmem:[#allocation2 + $0x148] sm:$0xff] %vm253_vm1, %v3307_v2  ;;  %3207 = vmatprep.mubr.msk.bf16.mxu0 %vm447_vm2, %v3280_v7  ;;  %v956_v41 = vmul.f32 %v3550_v34, %v734_v37  ;;  %v810_v50 = vmul.f32 %v3544_v26, %v734_v37  ;;  %v1121_v52 = vrot.slane %v1056_v42, 1  ;;  %v738_v53 = vld [vmem:[#allocation2 + $0x60] sm:$0xff] }
  0x1e   : > { %297 = vst.msk [vmem:[#allocation2 + $0x150] sm:$0xff] %vm253_vm1, %v3307_v2  ;;  %299 = vst.msk [vmem:[#allocation2 + $0x160] sm:$0xff] %vm253_vm1, %v3307_v2  ;;  %v904_v40 = vadd.f32 %v856_v33, %v804_v32  ;;  %v859_v56 = vmul.f32 %v3546_v27, %v734_v37  ;;  %v1694_v60 = vmul.f32 %v3559_v49, %v728_v39  ;;  %v4952_v1 = vrot.slane %v3557_v48, 1  ;;  %v746_v31 = vld [vmem:[#allocation2 + $0xa0] sm:$0xff] }
  0x1f   : > { %300 = vst.msk [vmem:[#allocation2 + $0x168] sm:$0xff] %vm253_vm1, %v3307_v2  ;;  %301 = vst.msk [vmem:[#allocation2 + $0x170] sm:$0xff] %vm253_vm1, %v3307_v2  ;;  %v3579_v0 = vmul.f32 %v3544_v26, %v728_v39  ;;  %v3591_v5 = vmul.f32 %v3559_v49, %v727_v36  ;;  %v813_v24 = vmul.f32 %v3544_v26, %v738_v53  ;;  %v3630_v32 = vld [vmem:[%s4946_s2] ss:$0 sm:$0xff] }
  0x20   : > { %303 = vst.msk [vmem:[#allocation2 + $0x180] sm:$0xff] %vm253_vm1, %v3307_v2  ;;  %304 = vst.msk [vmem:[#allocation2 + $0x188] sm:$0xff] %vm253_vm1, %v3307_v2  ;;  %v1004_v51 = vadd.f32 %v956_v41, %v904_v40  ;;  %v3623_v28 = vsel %vm1120_vm5, %v1121_v52, %v4952_v1 }
  0x21   : > { %305 = vst.msk [vmem:[#allocation2 + $0x190] sm:$0xff] %vm253_vm1, %v3307_v2  ;;  %307 = vst.msk [vmem:[#allocation2 + $0x1a0] sm:$0xff] %vm253_vm1, %v3307_v2  ;;  %v4951_v22 = vrot.slane %v3591_v5, 2  ;;  %v758_v42 = vld [vmem:[#allocation2 + $0x100] sm:$0xff] }
  0x22   : > { %308 = vst.msk [vmem:[#allocation2 + $0x1a8] sm:$0xff] %vm253_vm1, %v3307_v2  ;;  %309 = vst.msk [vmem:[#allocation2 + $0x1b0] sm:$0xff] %vm253_vm1, %v3307_v2  ;;  %v3588_v4 = vadd.f32 %v1121_v52, %v1004_v51  ;;  %v754_v51 = vld [vmem:[#allocation2 + $0xe0] sm:$0xff] }
  0x23   : > { %311 = vst.msk [vmem:[#allocation2 + $0x1c0] sm:$0xff] %vm253_vm1, %v3307_v2  ;;  %312 = vst.msk [vmem:[#allocation2 + $0x1c8] sm:$0xff] %vm253_vm1, %v3307_v2 }
  0x24   : > { %313 = vst.msk [vmem:[#allocation2 + $0x1d0] sm:$0xff] %vm253_vm1, %v3307_v2  ;;  %315 = vst.msk [vmem:[#allocation2 + $0x1e0] sm:$0xff] %vm253_vm1, %v3307_v2  ;;  %3208 = vmatmul.mubr.msk.bf16.gmra.mrb[8].mxu0 %vm447_vm2, %v3281_v8 }
  0x25   : > { %316 = vst.msk [vmem:[#allocation2 + $0x1e8] sm:$0xff] %vm253_vm1, %v3307_v2  ;;  %317 = vst.msk [vmem:[#allocation2 + $0x1f0] sm:$0xff] %vm253_vm1, %v3307_v2  ;;  %3211 = vmatprep.mubr.msk.bf16.mxu0 %vm447_vm2, %v3282_v9  ;;  %v742_v9 = vld [vmem:[#allocation2 + $0x80] sm:$0xff] }
  0x26   : > { %319 = vst.msk [vmem:[#allocation2 + $0x200] sm:$0xff] %vm253_vm1, %v3307_v2  ;;  %320 = vst.msk [vmem:[#allocation2 + $0x208] sm:$0xff] %vm253_vm1, %v3307_v2  ;;  %v962_v20 = vmul.f32 %v3550_v34, %v742_v9  ;;  %v865_v25 = vmul.f32 %v3546_v27, %v742_v9 }
  0x27   : > { %321 = vst.msk [vmem:[#allocation2 + $0x210] sm:$0xff] %vm253_vm1, %v3307_v2  ;;  %323 = vst.msk [vmem:[#allocation2 + $0x220] sm:$0xff] %vm253_vm1, %v3307_v2 }
  0x28   : > { %324 = vst.msk [vmem:[#allocation2 + $0x228] sm:$0xff] %vm253_vm1, %v3307_v2  ;;  %325 = vst.msk [vmem:[#allocation2 + $0x230] sm:$0xff] %vm253_vm1, %v3307_v2  ;;  %v913_v46 = vadd.f32 %v865_v25, %v813_v24  ;;  %v874_v24 = vmul.f32 %v3546_v27, %v754_v51 }
  0x29   : > { %258 = vst.msk [vmem:[#allocation2 + $0x18] sm:$0x1] %vm257_vm3, %v3307_v2  ;;  %262 = vst.msk [vmem:[#allocation2 + $0x38] sm:$0x1] %vm257_vm3, %v3307_v2 }
  0x2a   : > { %266 = vst.msk [vmem:[#allocation2 + $0x58] sm:$0x1] %vm257_vm3, %v3307_v2  ;;  %270 = vst.msk [vmem:[#allocation2 + $0x78] sm:$0x1] %vm257_vm3, %v3307_v2 }
  0x2b   : > { %274 = vst.msk [vmem:[#allocation2 + $0x98] sm:$0x1] %vm257_vm3, %v3307_v2  ;;  %278 = vst.msk [vmem:[#allocation2 + $0xb8] sm:$0x1] %vm257_vm3, %v3307_v2 }
  0x2c   : > { %3212 = vmatmul.mubr.msk.bf16.gmra.mrb[12].mxu0 %vm447_vm2, %v3283_v10  ;;  %282 = vst.msk [vmem:[#allocation2 + $0xd8] sm:$0x1] %vm257_vm3, %v3307_v2  ;;  %286 = vst.msk [vmem:[#allocation2 + $0xf8] sm:$0x1] %vm257_vm3, %v3307_v2 }
  0x2d   : > { %3215 = vmatprep.mubr.msk.bf16.mxu0 %vm447_vm2, %v3284_v11  ;;  %290 = vst.msk [vmem:[#allocation2 + $0x118] sm:$0x1] %vm257_vm3, %v3307_v2  ;;  %294 = vst.msk [vmem:[#allocation2 + $0x138] sm:$0x1] %vm257_vm3, %v3307_v2 }
  0x2e   : > { %298 = vst.msk [vmem:[#allocation2 + $0x158] sm:$0x1] %vm257_vm3, %v3307_v2  ;;  %302 = vst.msk [vmem:[#allocation2 + $0x178] sm:$0x1] %vm257_vm3, %v3307_v2 }
  0x2f   : > { %306 = vst.msk [vmem:[#allocation2 + $0x198] sm:$0x1] %vm257_vm3, %v3307_v2  ;;  %310 = vst.msk [vmem:[#allocation2 + $0x1b8] sm:$0x1] %vm257_vm3, %v3307_v2 }
  0x30   : > { %314 = vst.msk [vmem:[#allocation2 + $0x1d8] sm:$0x1] %vm257_vm3, %v3307_v2  ;;  %318 = vst.msk [vmem:[#allocation2 + $0x1f8] sm:$0x1] %vm257_vm3, %v3307_v2  ;;  %v729_v47 = vld [vmem:[#allocation2 + $0x18] sm:$0x1] }
  0x31   : > { %322 = vst.msk [vmem:[#allocation2 + $0x218] sm:$0x1] %vm257_vm3, %v3307_v2  ;;  %326 = vst.msk [vmem:[#allocation2 + $0x238] sm:$0x1] %vm257_vm3, %v3307_v2  ;;  %v737_v44 = vld [vmem:[#allocation2 + $0x58] sm:$0x1]  ;;  %v1695_v61 = vmul.f32 %v3559_v49, %v729_v47  ;;  %v862_v2 = vmul.f32 %v3546_v27, %v738_v53  ;;  %v816_v47 = vmul.f32 %v3544_v26, %v742_v9 }
  0x32   : > { %v733_v54 = vld [vmem:[#allocation2 + $0x38] sm:$0x1]  ;;  %v3567_v58 = vmul.f32 %v3559_v49, %v737_v44  ;;  %v3601_v11 = vmul.f32 %v3573_v62, %v737_v44 }
  0x33   : > { %v3594_v6 = vmul.f32 %v3559_v49, %v733_v54  ;;  %v3597_v7 = vmul.f32 %v3573_v62, %v733_v54  ;;  %v741_v8 = vld [vmem:[#allocation2 + $0x78] sm:$0x1]  ;;  %v910_v19 = vadd.f32 %v862_v2, %v810_v50  ;;  %v868_v50 = vmul.f32 %v3546_v27, %v746_v31 }
  0x34   : > { %3216 = vmatmul.mubr.msk.bf16.gmra.mrb[16].mxu0 %vm447_vm2, %v3285_v12  ;;  %v3604_v12 = vmul.f32 %v3586_v3, %v737_v44  ;;  %v3612_v21 = vmul.f32 %v3573_v62, %v741_v8  ;;  %v749_v43 = vld [vmem:[#allocation2 + $0xb8] sm:$0x1]  ;;  %v965_v54 = vmul.f32 %v3550_v34, %v746_v31 }
  0x35   : > { %3219 = vmatprep.mubr.msk.bf16.mxu0 %vm447_vm2, %v3286_v13  ;;  %v745_v13 = vld [vmem:[#allocation2 + $0x98] sm:$0x1]  ;;  %v3645_v41 = vadd.f32 %v962_v20, %v910_v19  ;;  %v3661_v9 = vmul.f32 %v3586_v3, %v749_v43 }
  0x36   : > { %v3616_v23 = vmul.f32 %v3586_v3, %v745_v13  ;;  %v3672_v10 = vmul.f32 %v3559_v49, %v745_v13  ;;  %v757_v40 = vld [vmem:[#allocation2 + $0xf8] sm:$0x1] }
  0x38   : > { %4959 = vst [vmem:[#allocation3_spill] sm:$0xff] %v3672_v10 }
  0x3c   : > { %3220 = vmatmul.mubr.msk.bf16.gmra.mrb[20].mxu0 %vm447_vm2, %v3287_v14  ;;  %v1791_v14 = vrot.slane %v1694_v60, 2  ;;  %v750_v60 = vld [vmem:[#allocation2 + $0xc0] sm:$0xff] }
  0x3d   : > { %3223 = vmatprep.mubr.msk.bf16.mxu0 %vm447_vm2, %v3288_v15  ;;  %v1793_v15 = vrot.slane %v1695_v61, 2  ;;  %v822_v20 = vmul.f32 %v3544_v26, %v750_v60  ;;  %v968_v45 = vmul.f32 %v3550_v34, %v750_v60 }
  0x3e   : > { %v3635_v33 = vsel %vm1789_vm6, %v4951_v22, %v1791_v14 }
  0x3f   : > { %v3638_v36 = vsel %vm1789_vm6, %v1791_v14, %v1793_v15  ;;  %v753_v14 = vld [vmem:[#allocation2 + $0xd8] sm:$0x1]  ;;  %v819_v15 = vmul.f32 %v3544_v26, %v746_v31 }
  0x44   : > { %3224 = vmatmul.mubr.msk.bf16.gmra.mrb[24].mxu0 %vm447_vm2, %v3289_v16  ;;  %v907_v16 = vadd.f32 %v859_v56, %v807_v55  ;;  %v3654_v55 = vmul.f32 %v3559_v49, %v741_v8  ;;  %v3657_v56 = vmul.f32 %v3573_v62, %v745_v13  ;;  %v3686_v13 = vadd.f32 %v965_v54, %v913_v46 }
  0x45   : > { %3227 = vmatprep.mubr.msk.bf16.mxu0 %vm447_vm2, %v3290_v17  ;;  %v959_v17 = vmul.f32 %v3550_v34, %v738_v53 }
  0x47   : > { %v3642_v39 = vadd.f32 %v959_v17, %v907_v16  ;;  %v871_v16 = vmul.f32 %v3546_v27, %v750_v60  ;;  %v3683_v60 = vmul.f32 %v3559_v49, %v749_v43 }
  0x49   : > { %4962 = vst [vmem:[#allocation6_spill] sm:$0xff] %v3683_v60 }
  0x4c   : > { %3228 = vmatmul.mubr.msk.bf16.gmra.mrb[28].mxu0 %vm447_vm2, %v3291_v18  ;;  %v3608_v18 = vmul.f32 %v3586_v3, %v741_v8 }
  0xe7   : > { %v3201_v44 = vpop.f32.mrb[0].mxu0 }
  0xe8   : > { %v543_v52 = vadd.f32 %v3201_v44, %v3630_v32  ;;  %v534_v53 = vpop.f32.mrb[1].mxu0 }
  0xe9   : > { %v535_v61 = vadd.f32 %v3630_v32, %v534_v53  ;;  %v3202_v2 = vpop.f32.mrb[2].mxu0  ;;  %v916_v53 = vadd.f32 %v868_v50, %v816_v47  ;;  %v919_v47 = vadd.f32 %v871_v16, %v819_v15  ;;  %v971_v50 = vmul.f32 %v3550_v34, %v754_v51 }
  0xea   : > { %v663_v17 = vmax.f32 %v543_v52, 0.0  ;;  %v546_v19 = vadd.f32 %v3202_v2, %v3630_v32  ;;  %v537_v8 = vpop.f32.mrb[3].mxu0  ;;  %v3675_v52 = vmul.f32 %v3573_v62, %v749_v43  ;;  %v3678_v2 = vmul.f32 %v3586_v3, %v753_v14 }
  0xeb   : > { %v661_v25 = vmax.f32 %v535_v61, 0.0  ;;  %v538_v44 = vadd.f32 %v3630_v32, %v537_v8  ;;  %v974_v8 = vmul.f32 %v3550_v34, %v758_v42  ;;  %v3697_v16 = vmul.f32 %v3586_v3, %v757_v40 }
  0xec   : > { %696 = vst.msk [vmem:[#allocation2 + $0x48] sm:$0xff] %vm253_vm1, %v663_v17  ;;  %v664_v31 = vmax.f32 %v546_v19, 0.0  ;;  %4960 = vst [vmem:[#allocation4_spill] sm:$0xff] %v3675_v52  ;;  %v3689_v17 = vmul.f32 %v3573_v62, %v753_v14  ;;  %v922_v19 = vadd.f32 %v874_v24, %v822_v20  ;;  %v3706_v51 = vadd.f32 %v971_v50, %v919_v47 }
  0xed   : > { %4961 = vst [vmem:[#allocation5_spill] sm:$0xff] %v3678_v2  ;;  %694 = vst.msk [vmem:[#allocation2 + $0x28] sm:$0xff] %vm253_vm1, %v661_v25  ;;  %v662_v61 = vmax.f32 %v538_v44, 0.0  ;;  %v3700_v44 = vadd.f32 %v968_v45, %v916_v53  ;;  %v3718_v47 = vmul.f32 %v3559_v49, %v753_v14 }
  0xee   : > { %697 = vst.msk [vmem:[#allocation2 + $0x50] sm:$0xff] %vm253_vm1, %v664_v31  ;;  %4963 = vst [vmem:[#allocation7_spill] sm:$0xff] %v3689_v17  ;;  %v3711_v53 = vadd.f32 %v974_v8, %v922_v19 }
  0xef   : > { %695 = vst.msk [vmem:[#allocation2 + $0x30] sm:$0xff] %vm253_vm1, %v662_v61  ;;  %v3205_v25 = vpop.f32.mrb[4].mxu0  ;;  %4964 = vst [vmem:[#allocation8_spill] sm:$0xff] %v3697_v16 }
  0xf0   : > { %v559_v46 = vadd.f32 %v3205_v25, %v3630_v32  ;;  %v550_v54 = vpop.f32.mrb[5].mxu0  ;;  %4965 = vst [vmem:[#allocation9_spill] sm:$0xff] %v3706_v51  ;;  %4966 = vst [vmem:[#allocation10_spill] sm:$0xff] %v3711_v53 }
  0xf1   : > { %v551_v24 = vadd.f32 %v3630_v32, %v550_v54  ;;  %v3206_v31 = vpop.f32.mrb[6].mxu0  ;;  %4967 = vst [vmem:[#allocation11_spill] sm:$0xff] %v3718_v47 }
  0xf2   : > { %v667_v40 = vmax.f32 %v559_v46, 0.0  ;;  %v562_v15 = vadd.f32 %v3206_v31, %v3630_v32  ;;  %v553_v25 = vpop.f32.mrb[7].mxu0 }
  0xf3   : > { %v665_v20 = vmax.f32 %v551_v24, 0.0  ;;  %v554_v42 = vadd.f32 %v3630_v32, %v553_v25  ;;  %v3714_v30 = vld [vmem:[#allocation2 + $0x48] sm:$0xff] }
  0xf4   : > { %700 = vst.msk [vmem:[#allocation2 + $0x88] sm:$0xff] %vm253_vm1, %v667_v40  ;;  %v668_v50 = vmax.f32 %v562_v15, 0.0  ;;  %v3721_v46 = vld [vmem:[#allocation2 + $0x28] sm:$0xff]  ;;  %v957_v31 = vmul.f32 %v3550_v34, %v3714_v30  ;;  %v1481_v19 = vmul.f32 %v3569_v59, %v3714_v30  ;;  %v3729_v8 = vmul.f32 %v3586_v3, %v3714_v30 }
  0xf5   : > { %698 = vst.msk [vmem:[#allocation2 + $0x68] sm:$0xff] %vm253_vm1, %v665_v20  ;;  %v666_v24 = vmax.f32 %v554_v42, 0.0  ;;  %v3732_v14 = vld [vmem:[#allocation2 + $0x50] sm:$0xff]  ;;  %v857_v15 = vmul.f32 %v3546_v27, %v3721_v46  ;;  %v1269_v40 = vmul.f32 %v3564_v57, %v3721_v46  ;;  %v1970_v25 = vmul.f32 %v3573_v62, %v3721_v46 }
  0xf6   : > { %701 = vst.msk [vmem:[#allocation2 + $0x90] sm:$0xff] %vm253_vm1, %v668_v50  ;;  %v3741_v54 = vld [vmem:[#allocation2 + $0x30] sm:$0xff]  ;;  %v958_v45 = vmul.f32 %v3550_v34, %v3732_v14  ;;  %v1482_v20 = vmul.f32 %v3569_v59, %v3732_v14  ;;  %v1545_v42 = vrot.slane %v1481_v19, 1  ;;  %v2247_v43 = vmul.f32 %v3586_v3, %v3732_v14 }
  0xf7   : > { %699 = vst.msk [vmem:[#allocation2 + $0x70] sm:$0xff] %vm253_vm1, %v666_v24  ;;  %v3209_v61 = vpop.f32.mrb[8].mxu0  ;;  %v858_v29 = vmul.f32 %v3546_v27, %v3741_v54  ;;  %v905_v50 = vadd.f32 %v857_v15, %v3576_v63  ;;  %v1270_v38 = vmul.f32 %v3564_v57, %v3741_v54  ;;  %v1333_v37 = vrot.slane %v1269_v40, 1 }
  0xf8   : > { %v575_v22 = vadd.f32 %v3209_v61, %v3630_v32  ;;  %v566_v1 = vpop.f32.mrb[9].mxu0  ;;  %v1546_v47 = vrot.slane %v1482_v20, 1  ;;  %v1971_v19 = vmul.f32 %v3573_v62, %v3741_v54  ;;  %v2066_v53 = vrot.slane %v1970_v25, 2 }
  0xf9   : > { %v567_v24 = vadd.f32 %v3630_v32, %v566_v1  ;;  %v3210_v16 = vpop.f32.mrb[10].mxu0  ;;  %v906_v17 = vadd.f32 %v858_v29, %v3579_v0  ;;  %v1005_v60 = vadd.f32 %v957_v31, %v905_v50  ;;  %v1334_v51 = vrot.slane %v1270_v38, 1 }
  0xfa   : > { %v671_v63 = vmax.f32 %v575_v22, 0.0  ;;  %v578_v15 = vadd.f32 %v3210_v16, %v3630_v32  ;;  %v569_v2 = vpop.f32.mrb[11].mxu0  ;;  %v1429_v40 = vadd.f32 %v1333_v37, %v3588_v4  ;;  %v1547_v61 = vsel %vm1120_vm5, %v1545_v42, %v1546_v47 }
  0xfb   : > { %v669_v20 = vmax.f32 %v567_v24, 0.0  ;;  %v570_v52 = vadd.f32 %v3630_v32, %v569_v2  ;;  %v1006_v10 = vadd.f32 %v958_v45, %v906_v17  ;;  %v1218_v25 = vadd.f32 %v3623_v28, %v1005_v60 }
  0xfc   : > { %704 = vst.msk [vmem:[#allocation2 + $0xc8] sm:$0xff] %vm253_vm1, %v671_v63  ;;  %v672_v1 = vmax.f32 %v578_v15, 0.0  ;;  %v1335_v0 = vsel %vm1120_vm5, %v1333_v37, %v1334_v51  ;;  %v1641_v29 = vadd.f32 %v1545_v42, %v1429_v40  ;;  %v2067_v22 = vrot.slane %v1971_v19, 2 }
  0xfd   : > { %702 = vst.msk [vmem:[#allocation2 + $0xa8] sm:$0xff] %vm253_vm1, %v669_v20  ;;  %v670_v38 = vmax.f32 %v570_v52, 0.0  ;;  %v4968_v4 = vrot.slane %v3557_v48, 1  ;;  %v1430_v31 = vadd.f32 %v1335_v0, %v1218_v25  ;;  %v2342_v50 = vrot.slane %v3729_v8, 2  ;;  %v3793_v20 = vld [vmem:[%s4948_s4] ss:$0 sm:$0xff] }
  0xfe   : > { %705 = vst.msk [vmem:[#allocation2 + $0xd0] sm:$0xff] %vm253_vm1, %v672_v1  ;;  %v4969_v28 = vrot.slane %v3591_v5, 2  ;;  %v2068_v60 = vsel %vm1789_vm6, %v2066_v53, %v2067_v22  ;;  %v4970_v37 = vrot.slane %v3597_v7, 2  ;;  %v2343_v45 = vrot.slane %v2247_v43, 2  ;;  %v3797_v25 = vld [vmem:[#allocation2 + $0x68] sm:$0xff] }
  0xff   : > { %v1219_v16 = vadd.f32 %v4968_v4, %v1006_v10  ;;  %703 = vst.msk [vmem:[#allocation2 + $0xb0] sm:$0xff] %vm253_vm1, %v670_v38  ;;  %v3213_v52 = vpop.f32.mrb[12].mxu0  ;;  %v1642_v10 = vadd.f32 %v1547_v61, %v1430_v31  ;;  %v808_v8 = vmul.f32 %v3544_v26, %v3721_v46  ;;  %v809_v42 = vmul.f32 %v3544_v26, %v3741_v54 }
 0x100   : > { %v1918_v2 = vadd.f32 %v4969_v28, %v1641_v29  ;;  %v2070_v17 = vsel %vm1789_vm6, %v2067_v22, %v4970_v37  ;;  %v591_v5 = vadd.f32 %v3213_v52, %v3630_v32  ;;  %v582_v19 = vpop.f32.mrb[13].mxu0  ;;  %v2344_v7 = vsel %vm1789_vm6, %v2342_v50, %v2343_v45 }
 0x101   : > { %v1431_v48 = vadd.f32 %v1334_v51, %v1219_v16  ;;  %v4971_v63 = vrot.slane %v3604_v12, 2  ;;  %v583_v15 = vadd.f32 %v3630_v32, %v582_v19  ;;  %v3214_v51 = vpop.f32.mrb[14].mxu0  ;;  %v1919_v61 = vadd.f32 %v3635_v33, %v1642_v10  ;;  %v3802_v33 = vld [vmem:[#allocation2 + $0x70] sm:$0xff] }
 0x102   : > { %v2194_v24 = vadd.f32 %v2066_v53, %v1918_v2  ;;  %v860_v53 = vmul.f32 %v3546_v27, %v3714_v30  ;;  %v675_v1 = vmax.f32 %v591_v5, 0.0  ;;  %v594_v12 = vadd.f32 %v3214_v51, %v3630_v32  ;;  %v585_v0 = vpop.f32.mrb[15].mxu0 }
 0x103   : > { %v2346_v43 = vsel %vm1789_vm6, %v2343_v45, %v4971_v63  ;;  %v1643_v40 = vadd.f32 %v1546_v47, %v1431_v48  ;;  %v861_v47 = vmul.f32 %v3546_v27, %v3732_v14  ;;  %v673_v22 = vmax.f32 %v583_v15, 0.0 }
 0x104   : > { %v2470_v29 = vadd.f32 %v2342_v50, %v2194_v24  ;;  %v586_v38 = vadd.f32 %v3630_v32, %v585_v0  ;;  %v2195_v16 = vadd.f32 %v2068_v60, %v1919_v61  ;;  %708 = vst.msk [vmem:[#allocation2 + $0x108] sm:$0xff] %vm253_vm1, %v675_v1  ;;  %v676_v31 = vmax.f32 %v594_v12, 0.0 }
 0x105   : > { %v1920_v4 = vadd.f32 %v3638_v36, %v1643_v40  ;;  %v908_v2 = vadd.f32 %v860_v53, %v808_v8  ;;  %v909_v37 = vadd.f32 %v861_v47, %v809_v42  ;;  %706 = vst.msk [vmem:[#allocation2 + $0xe8] sm:$0xff] %vm253_vm1, %v673_v22  ;;  %v960_v48 = vmul.f32 %v3550_v34, %v3797_v25 }
 0x106   : > { %v2525_v28 = vadd.f32 %v3793_v20, %v2470_v29  ;;  %v674_v50 = vmax.f32 %v586_v38, 0.0  ;;  %v2471_v52 = vadd.f32 %v2344_v7, %v2195_v16  ;;  %709 = vst.msk [vmem:[#allocation2 + $0x110] sm:$0xff] %vm253_vm1, %v676_v31  ;;  %v961_v36 = vmul.f32 %v3550_v34, %v3802_v33 }
 0x107   : > { %v2196_v45 = vadd.f32 %v2070_v17, %v1920_v4  ;;  %v1058_v60 = vmul.f32 %v3552_v35, %v3721_v46  ;;  %v1059_v8 = vmul.f32 %v3552_v35, %v3741_v54  ;;  %v3217_v42 = vpop.f32.mrb[16].mxu0  ;;  %v1008_v19 = vadd.f32 %v960_v48, %v908_v2 }
 0x108   : > { %v2573_v10 = vmax.f32 %v2525_v28, 0.0  ;;  %707 = vst.msk [vmem:[#allocation2 + $0xf0] sm:$0xff] %vm253_vm1, %v674_v50  ;;  %v2526_v5 = vadd.f32 %v3793_v20, %v2471_v52  ;;  %v1271_v24 = vmul.f32 %v3564_v57, %v3714_v30  ;;  %v607_v7 = vadd.f32 %v3217_v42, %v3630_v32  ;;  %v598_v63 = vpop.f32.mrb[17].mxu0 }
 0x109   : > { %v2472_v17 = vadd.f32 %v2346_v43, %v2196_v45  ;;  %v1009_v51 = vadd.f32 %v961_v36, %v909_v37  ;;  %v1124_v40 = vrot.slane %v1058_v60, 1  ;;  %v599_v61 = vadd.f32 %v3630_v32, %v598_v63  ;;  %v3218_v53 = vpop.f32.mrb[18].mxu0 }
 0x10a   : > { %v2670_v15 = vrot.slane %v2573_v10, 7  ;;  %v2574_v12 = vmax.f32 %v2526_v5, 0.0  ;;  %v1125_v0 = vrot.slane %v1059_v8, 1  ;;  %v679_v43 = vmax.f32 %v607_v7, 0.0  ;;  %v601_v47 = vpop.f32.mrb[19].mxu0 }
 0x10b   : > { %v2527_v1 = vadd.f32 %v3793_v20, %v2472_v17  ;;  %v610_v29 = vadd.f32 %v3218_v53, %v3630_v32  ;;  %v1220_v22 = vadd.f32 %v1124_v40, %v3642_v39  ;;  %v1272_v38 = vmul.f32 %v3564_v57, %v3732_v14 }
 0x10c   : > { %v677_v4 = vmax.f32 %v599_v61, 0.0  ;;  %v602_v16 = vadd.f32 %v3630_v32, %v601_v47  ;;  %v2671_v28 = vrot.slane %v2574_v12, 7  ;;  %712 = vst.msk [vmem:[#allocation2 + $0x148] sm:$0xff] %vm253_vm1, %v679_v43  ;;  %v1126_v37 = vsel %vm1120_vm5, %v1124_v40, %v1125_v0 }
 0x10d   : > { %v2575_v31 = vmax.f32 %v2527_v1, 0.0  ;;  %v680_v2 = vmax.f32 %v610_v29, 0.0  ;;  %v1222_v50 = vadd.f32 %v1125_v0, %v1009_v51  ;;  %v1336_v45 = vrot.slane %v1271_v24, 1 }
 0x10e   : > { %710 = vst.msk [vmem:[#allocation2 + $0x128] sm:$0xff] %vm253_vm1, %v677_v4  ;;  %v678_v52 = vmax.f32 %v602_v16, 0.0  ;;  %v2672_v39 = vsel %vm2669_vm7, %v2670_v15, %v2671_v28  ;;  %v1221_v10 = vadd.f32 %v1126_v37, %v1008_v19  ;;  %v1337_v36 = vrot.slane %v1272_v38, 1 }
 0x10f   : > { %v2673_v48 = vrot.slane %v2575_v31, 7  ;;  %713 = vst.msk [vmem:[#allocation2 + $0x150] sm:$0xff] %vm253_vm1, %v680_v2  ;;  %v1432_v60 = vadd.f32 %v1336_v45, %v1220_v22  ;;  %v1483_v8 = vmul.f32 %v3569_v59, %v3797_v25  ;;  %v1484_v42 = vmul.f32 %v3569_v59, %v3802_v33  ;;  %v3221_v17 = vpop.f32.mrb[20].mxu0 }
 0x110   : > { %711 = vst.msk [vmem:[#allocation2 + $0x130] sm:$0xff] %vm253_vm1, %v678_v52  ;;  %v1696_v24 = vmul.f32 %v3559_v49, %v3721_v46  ;;  %v1697_v19 = vmul.f32 %v3559_v49, %v3741_v54  ;;  %v1973_v7 = vmul.f32 %v3573_v62, %v3714_v30  ;;  %v623_v63 = vadd.f32 %v3221_v17, %v3630_v32  ;;  %v614_v15 = vpop.f32.mrb[21].mxu0 }
 0x111   : > { %v2674_v5 = vsel %vm2669_vm7, %v2671_v28, %v2673_v48  ;;  %v1338_v40 = vsel %vm1120_vm5, %v1336_v45, %v1337_v36  ;;  %v1434_v61 = vadd.f32 %v1337_v36, %v1222_v50  ;;  %v615_v53 = vadd.f32 %v3630_v32, %v614_v15  ;;  %v3222_v1 = vpop.f32.mrb[22].mxu0 }
 0x112   : > { %v2782_v51 = vpack.c.bf16 %v2674_v5, %v2672_v39  ;;  %v1433_v12 = vadd.f32 %v1338_v40, %v1221_v10  ;;  %v1548_v0 = vrot.slane %v1483_v8, 1  ;;  %v1549_v43 = vrot.slane %v1484_v42, 1  ;;  %v617_v54 = vpop.f32.mrb[23].mxu0 }
 0x113   : > { %v683_v46 = vmax.f32 %v623_v63, 0.0  ;;  %v626_v29 = vadd.f32 %v3222_v1, %v3630_v32  ;;  %v1795_v47 = vrot.slane %v1696_v24, 2  ;;  %v1796_v22 = vrot.slane %v1697_v19, 2 }
 0x114   : > { %3233 = vmatprep.mubr.msk.bf16.mxu1 %vm253_vm1, %v2782_v51  ;;  %v681_v38 = vmax.f32 %v615_v53, 0.0  ;;  %v618_v4 = vadd.f32 %v3630_v32, %v617_v54  ;;  %v1550_v16 = vsel %vm1120_vm5, %v1548_v0, %v1549_v43  ;;  %v1644_v31 = vadd.f32 %v1548_v0, %v1432_v60 }
 0x115   : > { %716 = vst.msk [vmem:[#allocation2 + $0x188] sm:$0xff] %vm253_vm1, %v683_v46  ;;  %v684_v28 = vmax.f32 %v626_v29, 0.0  ;;  %v1645_v2 = vadd.f32 %v1550_v16, %v1433_v12  ;;  %v1646_v37 = vadd.f32 %v1549_v43, %v1434_v61  ;;  %v1797_v50 = vsel %vm1789_vm6, %v1795_v47, %v1796_v22  ;;  %v3880_v46 = vld [vmem:[#allocation2 + $0x88] sm:$0xff] }
 0x116   : > { %714 = vst.msk [vmem:[#allocation2 + $0x168] sm:$0xff] %vm253_vm1, %v681_v38  ;;  %v682_v45 = vmax.f32 %v618_v4, 0.0  ;;  %v4972_v52 = vrot.slane %v3594_v6, 2  ;;  %v1921_v48 = vadd.f32 %v1795_v47, %v1644_v31  ;;  %v1974_v10 = vmul.f32 %v3573_v62, %v3732_v14 }
 0x117   : > { %717 = vst.msk [vmem:[#allocation2 + $0x190] sm:$0xff] %vm253_vm1, %v684_v28  ;;  %v1922_v36 = vadd.f32 %v1797_v50, %v1645_v2  ;;  %v2071_v8 = vrot.slane %v1973_v7, 2  ;;  %v2249_v42 = vmul.f32 %v3586_v3, %v3797_v25  ;;  %v3225_v17 = vpop.f32.mrb[24].mxu0  ;;  %v2250_v6 = vmul.f32 %v3586_v3, %v3802_v33  ;;  %v3887_v2 = vld [vmem:[#allocation2 + $0x90] sm:$0xff] }
 0x118   : > { %v1799_v39 = vsel %vm1789_vm6, %v1796_v22, %v4972_v52  ;;  %715 = vst.msk [vmem:[#allocation2 + $0x170] sm:$0xff] %vm253_vm1, %v682_v45  ;;  %v2072_v5 = vrot.slane %v1974_v10, 2  ;;  %v811_v24 = vmul.f32 %v3544_v26, %v3714_v30  ;;  %v812_v19 = vmul.f32 %v3544_v26, %v3732_v14  ;;  %v630_v15 = vpop.f32.mrb[25].mxu0 }
 0x119   : > { %v1923_v60 = vadd.f32 %v1799_v39, %v1646_v37  ;;  %v639_v63 = vadd.f32 %v3225_v17, %v3630_v32  ;;  %v2197_v7 = vadd.f32 %v2071_v8, %v1921_v48  ;;  %v2347_v51 = vrot.slane %v2249_v42, 2  ;;  %v3226_v43 = vpop.f32.mrb[26].mxu0 }
 0x11a   : > { %v863_v40 = vmul.f32 %v3546_v27, %v3797_v25  ;;  %v631_v61 = vadd.f32 %v3630_v32, %v630_v15  ;;  %v2073_v53 = vsel %vm1789_vm6, %v2071_v8, %v2072_v5  ;;  %v4973_v1 = vrot.slane %v3601_v11, 2  ;;  %v633_v38 = vpop.f32.mrb[27].mxu0 }
 0x11b   : > { %v2348_v0 = vrot.slane %v2250_v6, 2  ;;  %v687_v29 = vmax.f32 %v639_v63, 0.0  ;;  %v2198_v54 = vadd.f32 %v2073_v53, %v1922_v36  ;;  %v2473_v22 = vadd.f32 %v2347_v51, %v2197_v7 }
 0x11c   : > { %v2075_v12 = vsel %vm1789_vm6, %v2072_v5, %v4973_v1  ;;  %v685_v4 = vmax.f32 %v631_v61, 0.0  ;;  %v4974_v31 = vrot.slane %v3608_v18, 2  ;;  %v642_v11 = vadd.f32 %v3226_v43, %v3630_v32 }
 0x11d   : > { %v2199_v47 = vadd.f32 %v2075_v12, %v1923_v60  ;;  %v2349_v16 = vsel %vm1789_vm6, %v2347_v51, %v2348_v0  ;;  %720 = vst.msk [vmem:[#allocation2 + $0x1c8] sm:$0xff] %vm253_vm1, %v687_v29  ;;  %v2528_v45 = vadd.f32 %v3793_v20, %v2473_v22  ;;  %v634_v52 = vadd.f32 %v3630_v32, %v633_v38 }
 0x11e   : > { %v2351_v28 = vsel %vm1789_vm6, %v2348_v0, %v4974_v31  ;;  %v2474_v37 = vadd.f32 %v2349_v16, %v2198_v54  ;;  %718 = vst.msk [vmem:[#allocation2 + $0x1a8] sm:$0xff] %vm253_vm1, %v685_v4  ;;  %v688_v39 = vmax.f32 %v642_v11, 0.0  ;;  %v864_v18 = vmul.f32 %v3546_v27, %v3802_v33 }
 0x11f   : > { %v2475_v50 = vadd.f32 %v2351_v28, %v2199_v47  ;;  %v911_v48 = vadd.f32 %v863_v40, %v811_v24  ;;  %v963_v10 = vmul.f32 %v3550_v34, %v3880_v46  ;;  %v2576_v8 = vmax.f32 %v2528_v45, 0.0  ;;  %v3229_v24 = vpop.f32.mrb[28].mxu0 }
 0x120   : > { %v2529_v36 = vadd.f32 %v3793_v20, %v2474_v37  ;;  %v686_v42 = vmax.f32 %v634_v52, 0.0  ;;  %721 = vst.msk [vmem:[#allocation2 + $0x1d0] sm:$0xff] %vm253_vm1, %v688_v39  ;;  %v912_v17 = vadd.f32 %v864_v18, %v812_v19  ;;  %v964_v5 = vmul.f32 %v3550_v34, %v3887_v2  ;;  %v646_v61 = vpop.f32.mrb[29].mxu0 }
 0x121   : > { %v2530_v60 = vadd.f32 %v3793_v20, %v2475_v50  ;;  %v1011_v6 = vadd.f32 %v963_v10, %v911_v48  ;;  %v1060_v63 = vmul.f32 %v3552_v35, %v3714_v30  ;;  %v2675_v51 = vrot.slane %v2576_v8, 7  ;;  %v3911_v0 = vpop.f32.mrb[30].mxu0 }
 0x122   : > { %v2577_v15 = vmax.f32 %v2529_v36, 0.0  ;;  %719 = vst.msk [vmem:[#allocation2 + $0x1b0] sm:$0xff] %vm253_vm1, %v686_v42  ;;  %v1061_v40 = vmul.f32 %v3552_v35, %v3732_v14  ;;  %v1012_v53 = vadd.f32 %v964_v5, %v912_v17  ;;  %v1273_v19 = vmul.f32 %v3564_v57, %v3797_v25  ;;  %v3915_v22 = vpop.f32.mrb[31].mxu0 }
 0x123   : > { %v2578_v7 = vmax.f32 %v2530_v60, 0.0  ;;  %v1127_v1 = vrot.slane %v1060_v63, 1  ;;  %v1274_v12 = vmul.f32 %v3564_v57, %v3802_v33  ;;  %v1485_v47 = vmul.f32 %v3569_v59, %v3880_v46 }
 0x124   : > { %v2676_v43 = vrot.slane %v2577_v15, 7  ;;  %v1128_v54 = vrot.slane %v1061_v40, 1  ;;  %v1339_v4 = vrot.slane %v1273_v19, 1  ;;  %v1486_v31 = vmul.f32 %v3569_v59, %v3887_v2 }
 0x125   : > { %v2678_v29 = vrot.slane %v2578_v7, 7  ;;  %v1223_v38 = vadd.f32 %v1127_v1, %v3645_v41  ;;  %v1340_v16 = vrot.slane %v1274_v12, 1  ;;  %v1551_v10 = vrot.slane %v1485_v47, 1 }
 0x126   : > { %v2677_v28 = vsel %vm2669_vm7, %v2675_v51, %v2676_v43  ;;  %v1129_v37 = vsel %vm1120_vm5, %v1127_v1, %v1128_v54  ;;  %v1225_v50 = vadd.f32 %v1128_v54, %v1012_v53  ;;  %v1552_v41 = vrot.slane %v1486_v31, 1 }
 0x127   : > { %v2679_v11 = vsel %vm2669_vm7, %v2676_v43, %v2678_v29  ;;  %v1224_v52 = vadd.f32 %v1129_v37, %v1011_v6  ;;  %v1341_v39 = vsel %vm1120_vm5, %v1339_v4, %v1340_v16  ;;  %v1435_v18 = vadd.f32 %v1339_v4, %v1223_v38 }
 0x128   : > { %v2783_v45 = vpack.c.bf16 %v2679_v11, %v2677_v28  ;;  %v1437_v48 = vadd.f32 %v1340_v16, %v1225_v50  ;;  %v1699_v36 = vmul.f32 %v3559_v49, %v3714_v30  ;;  %v1700_v8 = vmul.f32 %v3559_v49, %v3732_v14 }
 0x129   : > { %v1436_v60 = vadd.f32 %v1341_v39, %v1224_v52  ;;  %v1976_v42 = vmul.f32 %v3573_v62, %v3797_v25  ;;  %v1977_v17 = vmul.f32 %v3573_v62, %v3802_v33  ;;  %v1553_v5 = vsel %vm1120_vm5, %v1551_v10, %v1552_v41 }
 0x12a   : > { %3234 = vmatmul.mubr.msk.bf16.vlgmr.msra.gmra.mrb[0].mxu1 %vm253_vm1, %v2783_v45  ;;  %v1647_v6 = vadd.f32 %v1551_v10, %v1435_v18  ;;  %v1649_v63 = vadd.f32 %v1552_v41, %v1437_v48  ;;  %v1800_v15 = vrot.slane %v1699_v36, 2  ;;  %v1801_v51 = vrot.slane %v1700_v8, 2  ;;  %v3952_v45 = vld [vmem:[#allocation2 + $0xb0] sm:$0xff] }
 0x12b   : > { %v1648_v7 = vadd.f32 %v1553_v5, %v1436_v60  ;;  %v2076_v30 = vrot.slane %v1976_v42, 2  ;;  %v2077_v40 = vrot.slane %v1977_v17, 2  ;;  %v2252_v1 = vmul.f32 %v3586_v3, %v3880_v46 }
 0x12c   : > { %v1924_v53 = vadd.f32 %v1800_v15, %v1647_v6  ;;  %v2253_v14 = vmul.f32 %v3586_v3, %v3887_v2  ;;  %v655_v19 = vadd.f32 %v3229_v24, %v3630_v32  ;;  %v1802_v12 = vsel %vm1789_vm6, %v1800_v15, %v1801_v51 }
 0x12d   : > { %v4975_v43 = vrot.slane %v3567_v58, 2  ;;  %v2078_v54 = vsel %vm1789_vm6, %v2076_v30, %v2077_v40  ;;  %v4976_v47 = vrot.slane %v3612_v21, 2  ;;  %v1925_v4 = vadd.f32 %v1802_v12, %v1648_v7  ;;  %v3950_v58 = vld [vmem:[#allocation2 + $0xa8] sm:$0xff] }
 0x12e   : > { %v2200_v31 = vadd.f32 %v2076_v30, %v1924_v53  ;;  %v2352_v28 = vrot.slane %v2252_v1, 2  ;;  %v2353_v11 = vrot.slane %v2253_v14, 2  ;;  %v691_v37 = vmax.f32 %v655_v19, 0.0 }
 0x12f   : > { %v1804_v29 = vsel %vm1789_vm6, %v1801_v51, %v4975_v43  ;;  %v2080_v38 = vsel %vm1789_vm6, %v2077_v40, %v4976_v47  ;;  %v647_v24 = vadd.f32 %v3630_v32, %v646_v61  ;;  %v814_v50 = vmul.f32 %v3544_v26, %v3797_v25 }
 0x130   : > { %v1926_v16 = vadd.f32 %v1804_v29, %v1649_v63  ;;  %v2201_v52 = vadd.f32 %v2078_v54, %v1925_v4  ;;  %v2476_v21 = vadd.f32 %v2352_v28, %v2200_v31  ;;  %v815_v18 = vmul.f32 %v3544_v26, %v3802_v33  ;;  %724 = vst.msk [vmem:[#allocation2 + $0x208] sm:$0xff] %vm253_vm1, %v691_v37 }
 0x131   : > { %v2354_v48 = vsel %vm1789_vm6, %v2352_v28, %v2353_v11  ;;  %v4977_v10 = vrot.slane %v3616_v23, 2  ;;  %v689_v61 = vmax.f32 %v647_v24, 0.0  ;;  %v866_v36 = vmul.f32 %v3546_v27, %v3880_v46 }
 0x132   : > { %v2202_v39 = vadd.f32 %v2080_v38, %v1926_v16  ;;  %v2477_v60 = vadd.f32 %v2354_v48, %v2201_v52  ;;  %v2531_v42 = vadd.f32 %v3793_v20, %v2476_v21  ;;  %v867_v17 = vmul.f32 %v3546_v27, %v3887_v2 }
 0x133   : > { %v2356_v41 = vsel %vm1789_vm6, %v2353_v11, %v4977_v10  ;;  %722 = vst.msk [vmem:[#allocation2 + $0x1e8] sm:$0xff] %vm253_vm1, %v689_v61  ;;  %v914_v5 = vadd.f32 %v866_v36, %v814_v50  ;;  %v966_v23 = vmul.f32 %v3550_v34, %v3950_v58  ;;  %v967_v6 = vmul.f32 %v3550_v34, %v3952_v45 }
 0x134   : > { %v2478_v8 = vadd.f32 %v2356_v41, %v2202_v39  ;;  %v1062_v63 = vmul.f32 %v3552_v35, %v3797_v25  ;;  %v2532_v15 = vadd.f32 %v3793_v20, %v2477_v60  ;;  %v2579_v51 = vmax.f32 %v2531_v42, 0.0 }
 0x135   : > { %v915_v30 = vadd.f32 %v867_v17, %v815_v18  ;;  %v1014_v40 = vadd.f32 %v966_v23, %v914_v5  ;;  %v1063_v53 = vmul.f32 %v3552_v35, %v3802_v33  ;;  %v1275_v14 = vmul.f32 %v3564_v57, %v3880_v46 }
 0x136   : > { %v2533_v7 = vadd.f32 %v3793_v20, %v2478_v8  ;;  %v1130_v1 = vrot.slane %v1062_v63, 1  ;;  %v2580_v19 = vmax.f32 %v2532_v15, 0.0  ;;  %v2680_v43 = vrot.slane %v2579_v51, 7 }
 0x137   : > { %v1015_v29 = vadd.f32 %v967_v6, %v915_v30  ;;  %v1131_v54 = vrot.slane %v1063_v53, 1  ;;  %v1276_v38 = vmul.f32 %v3564_v57, %v3887_v2  ;;  %v1342_v4 = vrot.slane %v1275_v14, 1 }
 0x138   : > { %v2581_v12 = vmax.f32 %v2533_v7, 0.0  ;;  %v1226_v47 = vadd.f32 %v1130_v1, %v3686_v13  ;;  %v2681_v16 = vrot.slane %v2580_v19, 7  ;;  %v1487_v28 = vmul.f32 %v3569_v59, %v3950_v58 }
 0x139   : > { %v1488_v11 = vmul.f32 %v3569_v59, %v3952_v45  ;;  %v1132_v37 = vsel %vm1120_vm5, %v1130_v1, %v1131_v54  ;;  %v1228_v24 = vadd.f32 %v1131_v54, %v1015_v29  ;;  %v1343_v50 = vrot.slane %v1276_v38, 1 }
 0x13a   : > { %v2683_v31 = vrot.slane %v2581_v12, 7  ;;  %v1438_v52 = vadd.f32 %v1342_v4, %v1226_v47  ;;  %v2682_v39 = vsel %vm2669_vm7, %v2680_v43, %v2681_v16  ;;  %v1227_v21 = vadd.f32 %v1132_v37, %v1014_v40 }
 0x13b   : > { %v1554_v18 = vrot.slane %v1487_v28, 1  ;;  %v1344_v10 = vsel %vm1120_vm5, %v1342_v4, %v1343_v50  ;;  %v1440_v41 = vadd.f32 %v1343_v50, %v1228_v24  ;;  %v1555_v61 = vrot.slane %v1488_v11, 1 }
 0x13c   : > { %v2684_v13 = vsel %vm2669_vm7, %v2681_v16, %v2683_v31  ;;  %v1439_v36 = vadd.f32 %v1344_v10, %v1227_v21  ;;  %v1702_v8 = vmul.f32 %v3559_v49, %v3797_v25  ;;  %v1703_v42 = vmul.f32 %v3559_v49, %v3802_v33  ;;  %v4016_v31 = vld [vmem:[#allocation2 + $0xc8] sm:$0xff] }
 0x13d   : > { %v2784_v48 = vpack.c.bf16 %v2684_v13, %v2682_v39  ;;  %v1650_v60 = vadd.f32 %v1554_v18, %v1438_v52  ;;  %v1556_v17 = vsel %vm1120_vm5, %v1554_v18, %v1555_v61  ;;  %v1652_v5 = vadd.f32 %v1555_v61, %v1440_v41 }
 0x13e   : > { %v1979_v23 = vmul.f32 %v3573_v62, %v3880_v46  ;;  %v1980_v6 = vmul.f32 %v3573_v62, %v3887_v2  ;;  %v1651_v63 = vadd.f32 %v1556_v17, %v1439_v36  ;;  %v1805_v15 = vrot.slane %v1702_v8, 2 }
 0x13f   : > { %3237 = vmatprep.mubr.msk.bf16.mxu1 %vm253_vm1, %v2784_v48  ;;  %v1806_v7 = vrot.slane %v1703_v42, 2  ;;  %v2255_v25 = vmul.f32 %v3586_v3, %v3950_v58  ;;  %v2256_v33 = vmul.f32 %v3586_v3, %v3952_v45  ;;  %v658_v40 = vadd.f32 %v3911_v0, %v3630_v32 }
 0x140   : > { %v2081_v51 = vrot.slane %v1979_v23, 2  ;;  %v2082_v30 = vrot.slane %v1980_v6, 2  ;;  %v4978_v1 = vrot.slane %v3654_v55, 2  ;;  %v1927_v19 = vadd.f32 %v1805_v15, %v1650_v60  ;;  %v4018_v55 = vld [vmem:[#allocation2 + $0xd0] sm:$0xff] }
 0x141   : > { %v1807_v53 = vsel %vm1789_vm6, %v1805_v15, %v1806_v7  ;;  %v2357_v12 = vrot.slane %v2255_v25, 2  ;;  %v4979_v47 = vrot.slane %v3657_v56, 2  ;;  %v2358_v4 = vrot.slane %v2256_v33, 2 }
 0x142   : > { %v1809_v14 = vsel %vm1789_vm6, %v1806_v7, %v4978_v1  ;;  %v1928_v43 = vadd.f32 %v1807_v53, %v1651_v63  ;;  %v2083_v54 = vsel %vm1789_vm6, %v2081_v51, %v2082_v30  ;;  %v2203_v3 = vadd.f32 %v2081_v51, %v1927_v19 }
 0x143   : > { %v1929_v29 = vadd.f32 %v1809_v14, %v1652_v5  ;;  %v2085_v38 = vsel %vm1789_vm6, %v2082_v30, %v4979_v47  ;;  %v692_v16 = vmax.f32 %v658_v40, 0.0  ;;  %v650_v0 = vadd.f32 %v3630_v32, %v3915_v22 }
 0x144   : > { %v2204_v28 = vadd.f32 %v2083_v54, %v1928_v43  ;;  %v817_v37 = vmul.f32 %v3544_v26, %v3880_v46  ;;  %v818_v56 = vmul.f32 %v3544_v26, %v3887_v2  ;;  %v2359_v24 = vsel %vm1789_vm6, %v2357_v12, %v2358_v4 }
 0x145   : > { %v2205_v11 = vadd.f32 %v2085_v38, %v1929_v29  ;;  %v4980_v50 = vrot.slane %v3661_v9, 2  ;;  %v2479_v39 = vadd.f32 %v2357_v12, %v2203_v3  ;;  %725 = vst.msk [vmem:[#allocation2 + $0x210] sm:$0xff] %vm253_vm1, %v692_v16  ;;  %v690_v32 = vmax.f32 %v650_v0, 0.0 }
 0x146   : > { %v2480_v22 = vadd.f32 %v2359_v24, %v2204_v28  ;;  %v869_v21 = vmul.f32 %v3546_v27, %v3950_v58  ;;  %v870_v18 = vmul.f32 %v3546_v27, %v3952_v45  ;;  %v969_v9 = vmul.f32 %v3550_v34, %v4016_v31 }
 0x147   : > { %v2361_v52 = vsel %vm1789_vm6, %v2358_v4, %v4980_v50  ;;  %v2534_v48 = vadd.f32 %v3793_v20, %v2479_v39  ;;  %723 = vst.msk [vmem:[#allocation2 + $0x1f0] sm:$0xff] %vm253_vm1, %v690_v32  ;;  %v970_v10 = vmul.f32 %v3550_v34, %v4018_v55  ;;  %v1064_v41 = vmul.f32 %v3552_v35, %v3880_v46  ;;  %v4070_v39 = vld [vmem:[%s4947_s3 + $0x8] ss:$0 sm:$0xff] }
 0x148   : > { %v2481_v13 = vadd.f32 %v2361_v52, %v2205_v11  ;;  %v2535_v61 = vadd.f32 %v3793_v20, %v2480_v22  ;;  %v917_v60 = vadd.f32 %v869_v21, %v817_v37  ;;  %v918_v8 = vadd.f32 %v870_v18, %v818_v56 }
 0x149   : > { %v2582_v42 = vmax.f32 %v2534_v48, 0.0  ;;  %v1065_v17 = vmul.f32 %v3552_v35, %v3887_v2  ;;  %v1133_v5 = vrot.slane %v1064_v41, 1  ;;  %v1277_v23 = vmul.f32 %v3564_v57, %v3950_v58  ;;  %v4981_v41 = vld [vmem:[#allocation3_spill] sm:$0xff] }
 0x14a   : > { %v2536_v36 = vadd.f32 %v3793_v20, %v2481_v13  ;;  %v2583_v6 = vmax.f32 %v2535_v61, 0.0  ;;  %v1017_v15 = vadd.f32 %v969_v9, %v917_v60  ;;  %v1018_v7 = vadd.f32 %v970_v10, %v918_v8 }
 0x14b   : > { %v2685_v25 = vrot.slane %v2582_v42, 7  ;;  %v1134_v51 = vrot.slane %v1065_v17, 1  ;;  %v1229_v30 = vadd.f32 %v1133_v5, %v3700_v44  ;;  %v1278_v33 = vmul.f32 %v3564_v57, %v3952_v45  ;;  %v4081_v42 = vld [vmem:[#allocation2 + $0xe8] sm:$0xff] }
 0x14c   : > { %v2584_v63 = vmax.f32 %v2536_v36, 0.0  ;;  %v2686_v40 = vrot.slane %v2583_v6, 7  ;;  %v1345_v1 = vrot.slane %v1277_v23, 1  ;;  %v1489_v14 = vmul.f32 %v3569_v59, %v4016_v31  ;;  %v4983_v6 = vld [vmem:[#allocation4_spill] sm:$0xff] }
 0x14d   : > { %v1135_v19 = vsel %vm1120_vm5, %v1133_v5, %v1134_v51  ;;  %v1231_v12 = vadd.f32 %v1134_v51, %v1018_v7  ;;  %v1346_v43 = vrot.slane %v1278_v33, 1  ;;  %v1490_v29 = vmul.f32 %v3569_v59, %v4018_v55  ;;  %v4091_v33 = vld [vmem:[#allocation2 + $0xf0] sm:$0xff] }
 0x14e   : > { %v2688_v53 = vrot.slane %v2584_v63, 7  ;;  %v2687_v54 = vsel %vm2669_vm7, %v2685_v25, %v2686_v40  ;;  %v1230_v47 = vadd.f32 %v1135_v19, %v1017_v15  ;;  %v1441_v38 = vadd.f32 %v1345_v1, %v1229_v30 }
 0x14f   : > { %v1347_v4 = vsel %vm1120_vm5, %v1345_v1, %v1346_v43  ;;  %v1443_v16 = vadd.f32 %v1346_v43, %v1231_v12  ;;  %v1557_v0 = vrot.slane %v1489_v14, 1  ;;  %v1558_v11 = vrot.slane %v1490_v29, 1  ;;  %v4985_v12 = vld [vmem:[#allocation5_spill] sm:$0xff] }
 0x150   : > { %v2689_v44 = vsel %vm2669_vm7, %v2686_v40, %v2688_v53  ;;  %v1442_v28 = vadd.f32 %v1347_v4, %v1230_v47  ;;  %v1705_v37 = vmul.f32 %v3559_v49, %v3880_v46  ;;  %v1706_v56 = vmul.f32 %v3559_v49, %v3887_v2 }
 0x151   : > { %v2785_v3 = vpack.c.bf16 %v2689_v44, %v2687_v54  ;;  %v1653_v24 = vadd.f32 %v1557_v0, %v1441_v38  ;;  %v1982_v50 = vmul.f32 %v3573_v62, %v3950_v58  ;;  %v1983_v52 = vmul.f32 %v3573_v62, %v3952_v45 }
 0x152   : > { %v2258_v46 = vmul.f32 %v4070_v39, %v4016_v31  ;;  %v1559_v32 = vsel %vm1120_vm5, %v1557_v0, %v1558_v11  ;;  %v1655_v2 = vadd.f32 %v1558_v11, %v1443_v16  ;;  %v1810_v22 = vrot.slane %v1705_v37, 2 }
 0x153   : > { %3238 = vmatmul.mubr.msk.bf16.gmra.mrb[4].mxu1 %vm253_vm1, %v2785_v3  ;;  %v1811_v13 = vrot.slane %v1706_v56, 2  ;;  %v1654_v21 = vadd.f32 %v1559_v32, %v1442_v28  ;;  %v2086_v18 = vrot.slane %v1982_v50, 2  ;;  %v2087_v48 = vrot.slane %v1983_v52, 2 }
 0x154   : > { %v2259_v9 = vmul.f32 %v4070_v39, %v4018_v55  ;;  %v4982_v61 = vrot.slane %v4981_v41, 2  ;;  %v1930_v60 = vadd.f32 %v1810_v22, %v1653_v24  ;;  %v2362_v8 = vrot.slane %v2258_v46, 2 }
 0x155   : > { %v1812_v10 = vsel %vm1789_vm6, %v1810_v22, %v1811_v13  ;;  %v2088_v23 = vsel %vm1789_vm6, %v2086_v18, %v2087_v48  ;;  %v4984_v63 = vrot.slane %v4983_v6, 2  ;;  %v820_v51 = vmul.f32 %v3544_v26, %v3950_v58 }
 0x156   : > { %v1814_v36 = vsel %vm1789_vm6, %v1811_v13, %v4982_v61  ;;  %v1931_v17 = vadd.f32 %v1812_v10, %v1654_v21  ;;  %v2206_v7 = vadd.f32 %v2086_v18, %v1930_v60  ;;  %v2363_v25 = vrot.slane %v2259_v9, 2  ;;  %v4987_v10 = vld [vmem:[#allocation9_spill] sm:$0xff] }
 0x157   : > { %v1932_v5 = vadd.f32 %v1814_v36, %v1655_v2  ;;  %v2090_v15 = vsel %vm1789_vm6, %v2087_v48, %v4984_v63  ;;  %v821_v30 = vmul.f32 %v3544_v26, %v3952_v45  ;;  %v872_v1 = vmul.f32 %v3546_v27, %v4016_v31 }
 0x158   : > { %v2207_v40 = vadd.f32 %v2088_v23, %v1931_v17  ;;  %v873_v14 = vmul.f32 %v3546_v27, %v4018_v55  ;;  %v2364_v19 = vsel %vm1789_vm6, %v2362_v8, %v2363_v25  ;;  %v4986_v43 = vrot.slane %v4985_v12, 2 }
 0x159   : > { %v2208_v53 = vadd.f32 %v2090_v15, %v1932_v5  ;;  %v2482_v54 = vadd.f32 %v2362_v8, %v2206_v7  ;;  %v972_v44 = vmul.f32 %v3550_v34, %v4081_v42  ;;  %v920_v3 = vadd.f32 %v872_v1, %v820_v51 }
 0x15a   : > { %v2366_v29 = vsel %vm1789_vm6, %v2363_v25, %v4986_v43  ;;  %v2483_v47 = vadd.f32 %v2364_v19, %v2207_v40  ;;  %v921_v4 = vadd.f32 %v873_v14, %v821_v30  ;;  %v973_v0 = vmul.f32 %v3550_v34, %v4091_v33 }
 0x15b   : > { %v2484_v38 = vadd.f32 %v2366_v29, %v2208_v53  ;;  %v2537_v16 = vadd.f32 %v3793_v20, %v2482_v54  ;;  %v1066_v28 = vmul.f32 %v3552_v35, %v3950_v58  ;;  %v1067_v11 = vmul.f32 %v3552_v35, %v3952_v45 }
 0x15c   : > { %v2538_v37 = vadd.f32 %v3793_v20, %v2483_v47  ;;  %v1020_v24 = vadd.f32 %v972_v44, %v920_v3  ;;  %v1279_v50 = vmul.f32 %v3564_v57, %v4016_v31  ;;  %v1021_v46 = vadd.f32 %v973_v0, %v921_v4  ;;  %v4137_v4 = vld [vmem:[#allocation2 + $0x108] sm:$0xff] }
 0x15d   : > { %v2539_v56 = vadd.f32 %v3793_v20, %v2484_v38  ;;  %v2585_v52 = vmax.f32 %v2537_v16, 0.0  ;;  %v1136_v32 = vrot.slane %v1066_v28, 1  ;;  %v1137_v2 = vrot.slane %v1067_v11, 1 }
 0x15e   : > { %v2586_v22 = vmax.f32 %v2538_v37, 0.0  ;;  %v1280_v21 = vmul.f32 %v3564_v57, %v4018_v55  ;;  %v1348_v18 = vrot.slane %v1279_v50, 1  ;;  %v1491_v23 = vmul.f32 %v3569_v59, %v4081_v42 }
 0x15f   : > { %v2587_v13 = vmax.f32 %v2539_v56, 0.0  ;;  %v2690_v48 = vrot.slane %v2585_v52, 7  ;;  %v1138_v9 = vsel %vm1120_vm5, %v1136_v32, %v1137_v2  ;;  %v1232_v41 = vadd.f32 %v1136_v32, %v4987_v10  ;;  %v4988_v56 = vld [vmem:[#allocation6_spill] sm:$0xff] }
 0x160   : > { %v1234_v61 = vadd.f32 %v1137_v2, %v1021_v46  ;;  %v2691_v36 = vrot.slane %v2586_v22, 7  ;;  %v1233_v8 = vadd.f32 %v1138_v9, %v1020_v24  ;;  %v1349_v17 = vrot.slane %v1280_v21, 1  ;;  %v4990_v46 = vld [vmem:[#allocation7_spill] sm:$0xff]  ;;  %v4151_v22 = vld [vmem:[#allocation2 + $0x110] sm:$0xff] }
 0x161   : > { %v2693_v60 = vrot.slane %v2587_v13, 7  ;;  %v1444_v5 = vadd.f32 %v1348_v18, %v1232_v41  ;;  %v1492_v6 = vmul.f32 %v3569_v59, %v4091_v33  ;;  %v1708_v63 = vmul.f32 %v3559_v49, %v3950_v58 }
 0x162   : > { %v2692_v15 = vsel %vm2669_vm7, %v2690_v48, %v2691_v36  ;;  %v1350_v25 = vsel %vm1120_vm5, %v1348_v18, %v1349_v17  ;;  %v1446_v51 = vadd.f32 %v1349_v17, %v1234_v61  ;;  %v1560_v53 = vrot.slane %v1491_v23, 1  ;;  %v4992_v17 = vld [vmem:[#allocation8_spill] sm:$0xff] }
 0x163   : > { %v2694_v7 = vsel %vm2669_vm7, %v2691_v36, %v2693_v60  ;;  %v1445_v40 = vadd.f32 %v1350_v25, %v1233_v8  ;;  %v1561_v1 = vrot.slane %v1492_v6, 1  ;;  %v1709_v14 = vmul.f32 %v3559_v49, %v3952_v45 }
 0x164   : > { %v2786_v30 = vpack.c.bf16 %v2694_v7, %v2692_v15  ;;  %v1815_v19 = vrot.slane %v1708_v63, 2  ;;  %v1985_v12 = vmul.f32 %v3573_v62, %v4016_v31  ;;  %v1986_v58 = vmul.f32 %v3573_v62, %v4018_v55 }
 0x165   : > { %v1562_v43 = vsel %vm1120_vm5, %v1560_v53, %v1561_v1  ;;  %v1656_v29 = vadd.f32 %v1560_v53, %v1444_v5  ;;  %v1658_v54 = vadd.f32 %v1561_v1, %v1446_v51  ;;  %v2261_v44 = vmul.f32 %v4070_v39, %v4081_v42 }
 0x166   : > { %3241 = vmatprep.mubr.msk.bf16.mxu1 %vm253_vm1, %v2786_v30  ;;  %v1657_v47 = vadd.f32 %v1562_v43, %v1445_v40  ;;  %v1816_v38 = vrot.slane %v1709_v14, 2  ;;  %v2091_v3 = vrot.slane %v1985_v12, 2  ;;  %v2092_v45 = vrot.slane %v1986_v58, 2 }
 0x167   : > { %v1933_v16 = vadd.f32 %v1815_v19, %v1656_v29  ;;  %v2262_v0 = vmul.f32 %v4070_v39, %v4091_v33  ;;  %v2367_v28 = vrot.slane %v2261_v44, 2  ;;  %v823_v11 = vmul.f32 %v3544_v26, %v4016_v31 }
 0x168   : > { %v1817_v37 = vsel %vm1789_vm6, %v1815_v19, %v1816_v38  ;;  %v4989_v24 = vrot.slane %v4988_v56, 2  ;;  %v2093_v52 = vsel %vm1789_vm6, %v2091_v3, %v2092_v45  ;;  %v4991_v32 = vrot.slane %v4990_v46, 2 }
 0x169   : > { %v1934_v13 = vadd.f32 %v1817_v37, %v1657_v47  ;;  %v2209_v18 = vadd.f32 %v2091_v3, %v1933_v16  ;;  %v2368_v48 = vrot.slane %v2262_v0, 2  ;;  %v824_v9 = vmul.f32 %v3544_v26, %v4018_v55  ;;  %v4994_v0 = vld [vmem:[#allocation10_spill] sm:$0xff] }
 0x16a   : > { %v1819_v50 = vsel %vm1789_vm6, %v1816_v38, %v4989_v24  ;;  %v2095_v2 = vsel %vm1789_vm6, %v2092_v45, %v4991_v32  ;;  %v875_v10 = vmul.f32 %v3546_v27, %v4081_v42  ;;  %v876_v41 = vmul.f32 %v3546_v27, %v4091_v33 }
 0x16b   : > { %v1935_v21 = vadd.f32 %v1819_v50, %v1658_v54  ;;  %v975_v61 = vmul.f32 %v3550_v34, %v4137_v4  ;;  %v2210_v36 = vadd.f32 %v2093_v52, %v1934_v13  ;;  %v2369_v8 = vsel %vm1789_vm6, %v2367_v28, %v2368_v48 }
 0x16c   : > { %v4993_v5 = vrot.slane %v4992_v17, 2  ;;  %v2485_v6 = vadd.f32 %v2367_v28, %v2209_v18  ;;  %v923_v63 = vadd.f32 %v875_v10, %v823_v11  ;;  %v924_v15 = vadd.f32 %v876_v41, %v824_v9 }
 0x16d   : > { %v2211_v60 = vadd.f32 %v2095_v2, %v1935_v21  ;;  %v976_v7 = vmul.f32 %v3550_v34, %v4151_v22  ;;  %v2486_v25 = vadd.f32 %v2369_v8, %v2210_v36  ;;  %v1068_v30 = vmul.f32 %v3552_v35, %v4016_v31  ;;  %v4191_v8 = vld [vmem:[#allocation2 + $0x118] sm:$0x1] }
 0x16e   : > { %v2371_v23 = vsel %vm1789_vm6, %v2368_v48, %v4993_v5  ;;  %v1069_v40 = vmul.f32 %v3552_v35, %v4018_v55  ;;  %v2540_v53 = vadd.f32 %v3793_v20, %v2485_v6  ;;  %v1023_v1 = vadd.f32 %v975_v61, %v923_v63 }
 0x16f   : > { %v2487_v51 = vadd.f32 %v2371_v23, %v2211_v60  ;;  %v1024_v14 = vadd.f32 %v976_v7, %v924_v15  ;;  %v1281_v19 = vmul.f32 %v3564_v57, %v4081_v42  ;;  %v2541_v12 = vadd.f32 %v3793_v20, %v2486_v25  ;;  %v4995_v23 = vld [vmem:[#allocation11_spill] sm:$0xff] }
 0x170   : > { %v1139_v43 = vrot.slane %v1068_v30, 1  ;;  %v1140_v29 = vrot.slane %v1069_v40, 1  ;;  %v2588_v54 = vmax.f32 %v2540_v53, 0.0  ;;  %v1282_v44 = vmul.f32 %v3564_v57, %v4091_v33 }
 0x171   : > { %v2542_v58 = vadd.f32 %v3793_v20, %v2487_v51  ;;  %v1351_v47 = vrot.slane %v1281_v19, 1  ;;  %v1493_v38 = vmul.f32 %v3569_v59, %v4137_v4  ;;  %v2589_v3 = vmax.f32 %v2541_v12, 0.0 }
 0x172   : > { %v1141_v16 = vsel %vm1120_vm5, %v1139_v43, %v1140_v29  ;;  %v1235_v28 = vadd.f32 %v1139_v43, %v4994_v0  ;;  %v2695_v11 = vrot.slane %v2588_v54, 7  ;;  %v1237_v56 = vadd.f32 %v1140_v29, %v1024_v14  ;;  %v3294_v0 = vld [vmem:[#allocation2 + $0xe0] sm:$0xff] }
 0x173   : > { %v2590_v45 = vmax.f32 %v2542_v58, 0.0  ;;  %v1236_v37 = vadd.f32 %v1141_v16, %v1023_v1  ;;  %v1352_v20 = vrot.slane %v1282_v44, 1  ;;  %v2696_v24 = vrot.slane %v2589_v3, 7 }
 0x174   : > { %v1447_v52 = vadd.f32 %v1351_v47, %v1235_v28  ;;  %v1494_v46 = vmul.f32 %v3569_v59, %v4151_v22  ;;  %v1563_v13 = vrot.slane %v1493_v38, 1  ;;  %v1711_v21 = vmul.f32 %v3559_v49, %v4016_v31 }
 0x175   : > { %v2698_v50 = vrot.slane %v2590_v45, 7  ;;  %v1353_v32 = vsel %vm1120_vm5, %v1351_v47, %v1352_v20  ;;  %v1449_v2 = vadd.f32 %v1352_v20, %v1237_v56  ;;  %v2697_v18 = vsel %vm2669_vm7, %v2695_v11, %v2696_v24 }
 0x176   : > { %v1448_v9 = vadd.f32 %v1353_v32, %v1236_v37  ;;  %v1564_v10 = vrot.slane %v1494_v46, 1  ;;  %v1659_v61 = vadd.f32 %v1563_v13, %v1447_v52  ;;  %v1712_v36 = vmul.f32 %v3559_v49, %v4018_v55  ;;  %v4200_v55 = vld [vmem:[#allocation2 + $0xf8] sm:$0x1]  ;;  %v4217_v37 = vld [vmem:[#allocation2 + $0x128] sm:$0xff]  ;;  %v4221_v52 = vld [vmem:[#allocation2 + $0x130] sm:$0xff] }
 0x177   : > { %v2699_v48 = vsel %vm2669_vm7, %v2696_v24, %v2698_v50  ;;  %v1820_v60 = vrot.slane %v1711_v21, 2  ;;  %v1823_v6 = vrot.slane %v4995_v23, 2  ;;  %v1988_v31 = vmul.f32 %v3573_v62, %v4081_v42  ;;  %v4223_v32 = vld [vmem:[#allocation2 + $0x120] sm:$0xff] }
 0x178   : > { %v2787_v41 = vpack.c.bf16 %v2699_v48, %v2697_v18  ;;  %v1565_v17 = vsel %vm1120_vm5, %v1563_v13, %v1564_v10  ;;  %v1661_v5 = vadd.f32 %v1564_v10, %v1449_v2  ;;  %v1821_v15 = vrot.slane %v1712_v36, 2  ;;  %v4227_v13 = vld [vmem:[#allocation2 + $0x100] sm:$0xff] }
 0x179   : > { %v1660_v63 = vadd.f32 %v1565_v17, %v1448_v9  ;;  %v1936_v7 = vadd.f32 %v1820_v60, %v1659_v61  ;;  %v1989_v25 = vmul.f32 %v3573_v62, %v4091_v33  ;;  %v1990_v51 = vmul.f32 %v4200_v55, %v3573_v62  ;;  %v4236_v9 = vld [vmem:[%s4948_s4] ss:$0 sm:$0xff] }
 0x17a   : > { %3242 = vmatmul.mubr.msk.bf16.gmra.mrb[8].mxu1 %vm253_vm1, %v2787_v41  ;;  %v2096_v30 = vrot.slane %v1988_v31, 2  ;;  %v2264_v40 = vmul.f32 %v4070_v39, %v4137_v4  ;;  %v2265_v53 = vmul.f32 %v4070_v39, %v4151_v22  ;;  %v1822_v1 = vsel %vm1789_vm6, %v1820_v60, %v1821_v15 }
 0x17b   : > { %v1824_v14 = vsel %vm1789_vm6, %v1821_v15, %v1823_v6  ;;  %v2097_v19 = vrot.slane %v1989_v25, 2  ;;  %v2266_v12 = vmul.f32 %v4070_v39, %v4191_v8  ;;  %v1937_v58 = vadd.f32 %v1822_v1, %v1660_v63 }
 0x17c   : > { %v1938_v43 = vadd.f32 %v1824_v14, %v1661_v5  ;;  %v2099_v29 = vrot.slane %v1990_v51, 2  ;;  %v2212_v54 = vadd.f32 %v2096_v30, %v1936_v7  ;;  %v2372_v47 = vrot.slane %v2264_v40, 2 }
 0x17d   : > { %v2098_v44 = vsel %vm1789_vm6, %v2096_v30, %v2097_v19  ;;  %v2373_v38 = vrot.slane %v2265_v53, 2  ;;  %v2375_v3 = vrot.slane %v2266_v12, 2  ;;  %v825_v28 = vmul.f32 %v3294_v0, %v3544_v26 }
 0x17e   : > { %v2100_v45 = vsel %vm1789_vm6, %v2097_v19, %v2099_v29  ;;  %v2213_v16 = vadd.f32 %v2098_v44, %v1937_v58  ;;  %v826_v11 = vmul.f32 %v3544_v26, %v4081_v42  ;;  %v2488_v50 = vadd.f32 %v2372_v47, %v2212_v54 }
 0x17f   : > { %v2214_v56 = vadd.f32 %v2100_v45, %v1938_v43  ;;  %v2374_v20 = vsel %vm1789_vm6, %v2372_v47, %v2373_v38  ;;  %v2376_v24 = vsel %vm1789_vm6, %v2373_v38, %v2375_v3  ;;  %v827_v2 = vmul.f32 %v3544_v26, %v4091_v33 }
 0x180   : > { %v2489_v46 = vadd.f32 %v2374_v20, %v2213_v16  ;;  %v877_v21 = vmul.f32 %v4227_v13, %v3546_v27  ;;  %v878_v18 = vmul.f32 %v3546_v27, %v4137_v4  ;;  %v2543_v10 = vadd.f32 %v4236_v9, %v2488_v50 }
 0x181   : > { %v2490_v48 = vadd.f32 %v2376_v24, %v2214_v56  ;;  %v879_v41 = vmul.f32 %v3546_v27, %v4151_v22  ;;  %v977_v61 = vmul.f32 %v3550_v34, %v4223_v32  ;;  %v978_v5 = vmul.f32 %v3550_v34, %v4217_v37 }
 0x182   : > { %v2544_v36 = vadd.f32 %v4236_v9, %v2489_v46  ;;  %v925_v60 = vadd.f32 %v877_v21, %v825_v28  ;;  %v926_v17 = vadd.f32 %v878_v18, %v826_v11  ;;  %v2591_v6 = vmax.f32 %v2543_v10, 0.0 }
 0x183   : > { %v2545_v23 = vadd.f32 %v4236_v9, %v2490_v48  ;;  %v927_v31 = vadd.f32 %v879_v41, %v827_v2  ;;  %v979_v63 = vmul.f32 %v3550_v34, %v4221_v52  ;;  %v1070_v51 = vmul.f32 %v3552_v35, %v4081_v42 }
 0x184   : > { %v2592_v15 = vmax.f32 %v2544_v36, 0.0  ;;  %v1025_v7 = vadd.f32 %v977_v61, %v925_v60  ;;  %v1026_v25 = vadd.f32 %v978_v5, %v926_v17  ;;  %v2700_v40 = vrot.slane %v2591_v6, 7 }
 0x185   : > { %v2593_v30 = vmax.f32 %v2545_v23, 0.0  ;;  %v1027_v53 = vadd.f32 %v979_v63, %v927_v31  ;;  %v1071_v1 = vmul.f32 %v3552_v35, %v4091_v33  ;;  %v1142_v19 = vrot.slane %v1070_v51, 1  ;;  %v4275_v23 = vld [vmem:[#allocation2 + $0x138] sm:$0x1] }
 0x186   : > { %v2701_v14 = vrot.slane %v2592_v15, 7  ;;  %v1283_v12 = vmul.f32 %v3564_v57, %v4137_v4  ;;  %v1284_v58 = vmul.f32 %v3564_v57, %v4151_v22  ;;  %v1495_v54 = vmul.f32 %v3569_v59, %v4217_v37 }
 0x187   : > { %v2703_v43 = vrot.slane %v2593_v30, 7  ;;  %v1143_v29 = vrot.slane %v1071_v1, 1  ;;  %v1496_v44 = vmul.f32 %v3569_v59, %v4221_v52  ;;  %v1238_v38 = vadd.f32 %v1142_v19, %v1025_v7 }
 0x188   : > { %v2702_v47 = vsel %vm2669_vm7, %v2700_v40, %v2701_v14  ;;  %v1354_v3 = vrot.slane %v1283_v12, 1  ;;  %v1355_v45 = vrot.slane %v1284_v58, 1  ;;  %v1566_v11 = vrot.slane %v1495_v54, 1 }
 0x189   : > { %v2704_v16 = vsel %vm2669_vm7, %v2701_v14, %v2703_v43  ;;  %v1144_v0 = vsel %vm1120_vm5, %v1142_v19, %v1143_v29  ;;  %v1240_v28 = vadd.f32 %v1143_v29, %v1027_v53  ;;  %v1567_v2 = vrot.slane %v1496_v44, 1 }
 0x18a   : > { %v2788_v56 = vpack.c.bf16 %v2704_v16, %v2702_v47  ;;  %v1239_v20 = vadd.f32 %v1144_v0, %v1026_v25  ;;  %v1356_v24 = vsel %vm1120_vm5, %v1354_v3, %v1355_v45  ;;  %v1450_v50 = vadd.f32 %v1354_v3, %v1238_v38  ;;  %v4293_v3 = vld [vmem:[#allocation2 + $0x148] sm:$0xff]  ;;  %v4295_v16 = vld [vmem:[#allocation2 + $0x140] sm:$0xff] }
 0x18b   : > { %v1452_v46 = vadd.f32 %v1355_v45, %v1240_v28  ;;  %v1714_v21 = vmul.f32 %v3559_v49, %v4081_v42  ;;  %v1715_v18 = vmul.f32 %v3559_v49, %v4091_v33  ;;  %v1716_v41 = vmul.f32 %v4200_v55, %v3559_v49 }
 0x18c   : > { %3245 = vmatprep.mubr.msk.bf16.mxu1 %vm253_vm1, %v2788_v56  ;;  %v1451_v48 = vadd.f32 %v1356_v24, %v1239_v20  ;;  %v1662_v10 = vadd.f32 %v1566_v11, %v1450_v50  ;;  %v1991_v61 = vmul.f32 %v3573_v62, %v4137_v4  ;;  %v1568_v36 = vsel %vm1120_vm5, %v1566_v11, %v1567_v2  ;;  %v4303_v56 = vld [vmem:[#allocation2 + $0x150] sm:$0xff] }
 0x18d   : > { %v1664_v60 = vadd.f32 %v1567_v2, %v1452_v46  ;;  %v1825_v17 = vrot.slane %v1714_v21, 2  ;;  %v1826_v5 = vrot.slane %v1715_v18, 2  ;;  %v1828_v6 = vrot.slane %v1716_v41, 2 }
 0x18e   : > { %v1663_v42 = vadd.f32 %v1568_v36, %v1451_v48  ;;  %v1992_v33 = vmul.f32 %v3573_v62, %v4151_v22  ;;  %v1993_v31 = vmul.f32 %v3573_v62, %v4191_v8  ;;  %v2101_v15 = vrot.slane %v1991_v61, 2 }
 0x18f   : > { %v1827_v55 = vsel %vm1789_vm6, %v1825_v17, %v1826_v5  ;;  %v1939_v63 = vadd.f32 %v1825_v17, %v1662_v10  ;;  %v2267_v7 = vmul.f32 %v4070_v39, %v4217_v37  ;;  %v1829_v25 = vsel %vm1789_vm6, %v1826_v5, %v1828_v6 }
 0x190   : > { %v1940_v51 = vadd.f32 %v1827_v55, %v1663_v42  ;;  %v2102_v30 = vrot.slane %v1992_v33, 2  ;;  %v2104_v40 = vrot.slane %v1993_v31, 2  ;;  %v1941_v53 = vadd.f32 %v1829_v25, %v1664_v60 }
 0x191   : > { %v2215_v1 = vadd.f32 %v2101_v15, %v1939_v63  ;;  %v2268_v14 = vmul.f32 %v4070_v39, %v4221_v52  ;;  %v2269_v19 = vmul.f32 %v4070_v39, %v4275_v23  ;;  %v2377_v43 = vrot.slane %v2267_v7, 2 }
 0x192   : > { %v2103_v12 = vsel %vm1789_vm6, %v2101_v15, %v2102_v30  ;;  %v2105_v58 = vsel %vm1789_vm6, %v2102_v30, %v2104_v40  ;;  %v828_v29 = vmul.f32 %v4227_v13, %v3544_v26  ;;  %v829_v0 = vmul.f32 %v3544_v26, %v4137_v4 }
 0x193   : > { %v2216_v54 = vadd.f32 %v2103_v12, %v1940_v51  ;;  %v2217_v44 = vadd.f32 %v2105_v58, %v1941_v53  ;;  %v2378_v47 = vrot.slane %v2268_v14, 2  ;;  %v2380_v38 = vrot.slane %v2269_v19, 2 }
 0x194   : > { %v2491_v45 = vadd.f32 %v2377_v43, %v2215_v1  ;;  %v830_v28 = vmul.f32 %v3544_v26, %v4151_v22  ;;  %v880_v11 = vmul.f32 %v3546_v27, %v4223_v32  ;;  %v881_v24 = vmul.f32 %v3546_v27, %v4217_v37 }
 0x195   : > { %v2379_v13 = vsel %vm1789_vm6, %v2377_v43, %v2378_v47  ;;  %v2381_v20 = vsel %vm1789_vm6, %v2378_v47, %v2380_v38  ;;  %v882_v50 = vmul.f32 %v3546_v27, %v4221_v52  ;;  %v980_v41 = vmul.f32 %v3550_v34, %v4295_v16 }
 0x196   : > { %v2492_v46 = vadd.f32 %v2379_v13, %v2216_v54  ;;  %v2493_v2 = vadd.f32 %v2381_v20, %v2217_v44  ;;  %v2546_v21 = vadd.f32 %v4236_v9, %v2491_v45  ;;  %v928_v18 = vadd.f32 %v880_v11, %v828_v29 }
 0x197   : > { %v929_v48 = vadd.f32 %v881_v24, %v829_v0  ;;  %v930_v10 = vadd.f32 %v882_v50, %v830_v28  ;;  %v981_v61 = vmul.f32 %v3550_v34, %v4293_v3  ;;  %v982_v5 = vmul.f32 %v3550_v34, %v4303_v56 }
 0x198   : > { %v2547_v36 = vadd.f32 %v4236_v9, %v2492_v46  ;;  %v2548_v60 = vadd.f32 %v4236_v9, %v2493_v2  ;;  %v2594_v17 = vmax.f32 %v2546_v21, 0.0  ;;  %v1028_v42 = vadd.f32 %v980_v41, %v928_v18 }
 0x199   : > { %v1029_v6 = vadd.f32 %v981_v61, %v929_v48  ;;  %v1072_v33 = vmul.f32 %v3552_v35, %v4137_v4  ;;  %v1073_v31 = vmul.f32 %v3552_v35, %v4151_v22  ;;  %v1030_v7 = vadd.f32 %v982_v5, %v930_v10 }
 0x19a   : > { %v2595_v55 = vmax.f32 %v2547_v36, 0.0  ;;  %v2596_v63 = vmax.f32 %v2548_v60, 0.0  ;;  %v2705_v15 = vrot.slane %v2594_v17, 7  ;;  %v1285_v30 = vmul.f32 %v3564_v57, %v4217_v37  ;;  %v4346_v36 = vld [vmem:[#allocation2 + $0x158] sm:$0x1] }
 0x19b   : > { %v1145_v25 = vrot.slane %v1072_v33, 1  ;;  %v1146_v51 = vrot.slane %v1073_v31, 1  ;;  %v1286_v40 = vmul.f32 %v3564_v57, %v4221_v52  ;;  %v1497_v14 = vmul.f32 %v3569_v59, %v4293_v3 }
 0x19c   : > { %v2706_v53 = vrot.slane %v2595_v55, 7  ;;  %v2708_v1 = vrot.slane %v2596_v63, 7  ;;  %v1498_v19 = vmul.f32 %v3569_v59, %v4303_v56  ;;  %v1357_v29 = vrot.slane %v1285_v30, 1 }
 0x19d   : > { %v1147_v12 = vsel %vm1120_vm5, %v1145_v25, %v1146_v51  ;;  %v1241_v58 = vadd.f32 %v1145_v25, %v1028_v42  ;;  %v1243_v43 = vadd.f32 %v1146_v51, %v1030_v7  ;;  %v1358_v38 = vrot.slane %v1286_v40, 1 }
 0x19e   : > { %v2707_v54 = vsel %vm2669_vm7, %v2705_v15, %v2706_v53  ;;  %v2709_v44 = vsel %vm2669_vm7, %v2706_v53, %v2708_v1  ;;  %v1242_v47 = vadd.f32 %v1147_v12, %v1029_v6  ;;  %v1569_v28 = vrot.slane %v1497_v14, 1 }
 0x19f   : > { %v2789_v45 = vpack.c.bf16 %v2709_v44, %v2707_v54  ;;  %v1453_v0 = vadd.f32 %v1357_v29, %v1241_v58  ;;  %v1570_v11 = vrot.slane %v1498_v19, 1  ;;  %v1359_v13 = vsel %vm1120_vm5, %v1357_v29, %v1358_v38 }
 0x1a0   : > { %v1455_v20 = vadd.f32 %v1358_v38, %v1243_v43  ;;  %v1717_v24 = vmul.f32 %v3559_v49, %v4137_v4  ;;  %v1718_v50 = vmul.f32 %v3559_v49, %v4151_v22  ;;  %v1454_v46 = vadd.f32 %v1359_v13, %v1242_v47  ;;  %v4364_v43 = vld [vmem:[#allocation2 + $0x168] sm:$0xff]  ;;  %v4372_v38 = vld [vmem:[#allocation2 + $0x170] sm:$0xff] }
 0x1a1   : > { %3246 = vmatmul.mubr.msk.bf16.gmra.mrb[12].mxu1 %vm253_vm1, %v2789_v45  ;;  %v1571_v2 = vsel %vm1120_vm5, %v1569_v28, %v1570_v11  ;;  %v1665_v21 = vadd.f32 %v1569_v28, %v1453_v0  ;;  %v1719_v18 = vmul.f32 %v3559_v49, %v4191_v8  ;;  %v1994_v61 = vmul.f32 %v3573_v62, %v4217_v37 }
 0x1a2   : > { %v1667_v48 = vadd.f32 %v1570_v11, %v1455_v20  ;;  %v1830_v10 = vrot.slane %v1717_v24, 2  ;;  %v1831_v41 = vrot.slane %v1718_v50, 2  ;;  %v1666_v4 = vadd.f32 %v1571_v2, %v1454_v46  ;;  %v4381_v24 = vld [vmem:[#allocation2 + $0x160] sm:$0xff] }
 0x1a3   : > { %v1833_v60 = vrot.slane %v1719_v18, 2  ;;  %v1995_v22 = vmul.f32 %v3573_v62, %v4221_v52  ;;  %v1996_v17 = vmul.f32 %v3573_v62, %v4275_v23  ;;  %v2106_v8 = vrot.slane %v1994_v61, 2 }
 0x1a4   : > { %v1832_v5 = vsel %vm1789_vm6, %v1830_v10, %v1831_v41  ;;  %v1942_v42 = vadd.f32 %v1830_v10, %v1665_v21  ;;  %v2270_v6 = vmul.f32 %v4070_v39, %v4293_v3  ;;  %v2271_v25 = vmul.f32 %v4070_v39, %v4303_v56 }
 0x1a5   : > { %v1834_v33 = vsel %vm1789_vm6, %v1831_v41, %v1833_v60  ;;  %v1943_v31 = vadd.f32 %v1832_v5, %v1666_v4  ;;  %v2107_v55 = vrot.slane %v1995_v22, 2  ;;  %v2109_v63 = vrot.slane %v1996_v17, 2 }
 0x1a6   : > { %v1944_v15 = vadd.f32 %v1834_v33, %v1667_v48  ;;  %v2218_v7 = vadd.f32 %v2106_v8, %v1942_v42  ;;  %v2272_v51 = vmul.f32 %v4070_v39, %v4346_v36  ;;  %v2382_v53 = vrot.slane %v2270_v6, 2 }
 0x1a7   : > { %v2108_v30 = vsel %vm1789_vm6, %v2106_v8, %v2107_v55  ;;  %v2110_v40 = vsel %vm1789_vm6, %v2107_v55, %v2109_v63  ;;  %v831_v1 = vmul.f32 %v3544_v26, %v4223_v32  ;;  %v2383_v12 = vrot.slane %v2271_v25, 2 }
 0x1a8   : > { %v2219_v14 = vadd.f32 %v2108_v30, %v1943_v31  ;;  %v2220_v19 = vadd.f32 %v2110_v40, %v1944_v15  ;;  %v2385_v58 = vrot.slane %v2272_v51, 2  ;;  %v2494_v29 = vadd.f32 %v2382_v53, %v2218_v7 }
 0x1a9   : > { %v832_v54 = vmul.f32 %v3544_v26, %v4217_v37  ;;  %v833_v44 = vmul.f32 %v3544_v26, %v4221_v52  ;;  %v883_v47 = vmul.f32 %v3546_v27, %v4295_v16  ;;  %v2384_v32 = vsel %vm1789_vm6, %v2382_v53, %v2383_v12 }
 0x1aa   : > { %v2386_v45 = vsel %vm1789_vm6, %v2383_v12, %v2385_v58  ;;  %v884_v0 = vmul.f32 %v3546_v27, %v4293_v3  ;;  %v885_v28 = vmul.f32 %v3546_v27, %v4303_v56  ;;  %v2495_v11 = vadd.f32 %v2384_v32, %v2219_v14 }
 0x1ab   : > { %v2496_v13 = vadd.f32 %v2386_v45, %v2220_v19  ;;  %v2549_v20 = vadd.f32 %v4236_v9, %v2494_v29  ;;  %v931_v50 = vadd.f32 %v883_v47, %v831_v1  ;;  %v983_v21 = vmul.f32 %v3550_v34, %v4381_v24 }
 0x1ac   : > { %v932_v46 = vadd.f32 %v884_v0, %v832_v54  ;;  %v933_v2 = vadd.f32 %v885_v28, %v833_v44  ;;  %v984_v18 = vmul.f32 %v3550_v34, %v4364_v43  ;;  %v2550_v48 = vadd.f32 %v4236_v9, %v2495_v11 }
 0x1ad   : > { %v2551_v10 = vadd.f32 %v4236_v9, %v2496_v13  ;;  %v2597_v41 = vmax.f32 %v2549_v20, 0.0  ;;  %v985_v61 = vmul.f32 %v3550_v34, %v4372_v38  ;;  %v1031_v4 = vadd.f32 %v983_v21, %v931_v50 }
 0x1ae   : > { %v1032_v60 = vadd.f32 %v984_v18, %v932_v46  ;;  %v1074_v22 = vmul.f32 %v3552_v35, %v4217_v37  ;;  %v1075_v17 = vmul.f32 %v3552_v35, %v4221_v52  ;;  %v2598_v5 = vmax.f32 %v2550_v48, 0.0  ;;  %v4417_v48 = vld [vmem:[#allocation2 + $0x178] sm:$0x1] }
 0x1af   : > { %v2599_v42 = vmax.f32 %v2551_v10, 0.0  ;;  %v2710_v8 = vrot.slane %v2597_v41, 7  ;;  %v1033_v6 = vadd.f32 %v985_v61, %v933_v2  ;;  %v1287_v55 = vmul.f32 %v3564_v57, %v4293_v3 }
 0x1b0   : > { %v1148_v33 = vrot.slane %v1074_v22, 1  ;;  %v1149_v31 = vrot.slane %v1075_v17, 1  ;;  %v1288_v63 = vmul.f32 %v3564_v57, %v4303_v56  ;;  %v2711_v15 = vrot.slane %v2598_v5, 7 }
 0x1b1   : > { %v2713_v7 = vrot.slane %v2599_v42, 7  ;;  %v1499_v25 = vmul.f32 %v3569_v59, %v4364_v43  ;;  %v1500_v51 = vmul.f32 %v3569_v59, %v4372_v38  ;;  %v1360_v1 = vrot.slane %v1287_v55, 1 }
 0x1b2   : > { %v1150_v30 = vsel %vm1120_vm5, %v1148_v33, %v1149_v31  ;;  %v1244_v40 = vadd.f32 %v1148_v33, %v1031_v4  ;;  %v1246_v53 = vadd.f32 %v1149_v31, %v1033_v6  ;;  %v2712_v14 = vsel %vm2669_vm7, %v2710_v8, %v2711_v15 }
 0x1b3   : > { %v2714_v19 = vsel %vm2669_vm7, %v2711_v15, %v2713_v7  ;;  %v1245_v12 = vadd.f32 %v1150_v30, %v1032_v60  ;;  %v1361_v58 = vrot.slane %v1288_v63, 1  ;;  %v1572_v44 = vrot.slane %v1499_v25, 1 }
 0x1b4   : > { %v2790_v29 = vpack.c.bf16 %v2714_v19, %v2712_v14  ;;  %v1456_v54 = vadd.f32 %v1360_v1, %v1244_v40  ;;  %v1573_v47 = vrot.slane %v1500_v51, 1  ;;  %v1720_v0 = vmul.f32 %v3559_v49, %v4217_v37  ;;  %v4437_v14 = vld [vmem:[#allocation2 + $0x180] sm:$0xff] }
 0x1b5   : > { %v1362_v32 = vsel %vm1120_vm5, %v1360_v1, %v1361_v58  ;;  %v1458_v45 = vadd.f32 %v1361_v58, %v1246_v53  ;;  %v1721_v28 = vmul.f32 %v3559_v49, %v4221_v52  ;;  %v1722_v50 = vmul.f32 %v3559_v49, %v4275_v23  ;;  %v4435_v53 = vld [vmem:[#allocation2 + $0x188] sm:$0xff]  ;;  %v4445_v58 = vld [vmem:[#allocation2 + $0x190] sm:$0xff] }
 0x1b6   : > { %3249 = vmatprep.mubr.msk.bf16.mxu1 %vm253_vm1, %v2790_v29  ;;  %v1457_v11 = vadd.f32 %v1362_v32, %v1245_v12  ;;  %v1574_v13 = vsel %vm1120_vm5, %v1572_v44, %v1573_v47  ;;  %v1668_v20 = vadd.f32 %v1572_v44, %v1456_v54  ;;  %v1835_v2 = vrot.slane %v1720_v0, 2 }
 0x1b7   : > { %v1670_v46 = vadd.f32 %v1573_v47, %v1458_v45  ;;  %v1836_v21 = vrot.slane %v1721_v28, 2  ;;  %v1997_v18 = vmul.f32 %v3573_v62, %v4293_v3  ;;  %v1838_v10 = vrot.slane %v1722_v50, 2 }
 0x1b8   : > { %v1669_v37 = vadd.f32 %v1574_v13, %v1457_v11  ;;  %v1998_v52 = vmul.f32 %v3573_v62, %v4303_v56  ;;  %v1999_v41 = vmul.f32 %v3573_v62, %v4346_v36  ;;  %v1945_v4 = vadd.f32 %v1835_v2, %v1668_v20 }
 0x1b9   : > { %v1837_v61 = vsel %vm1789_vm6, %v1835_v2, %v1836_v21  ;;  %v2111_v23 = vrot.slane %v1997_v18, 2  ;;  %v2273_v60 = vmul.f32 %v4070_v39, %v4364_v43  ;;  %v1839_v22 = vsel %vm1789_vm6, %v1836_v21, %v1838_v10 }
 0x1ba   : > { %v1946_v17 = vadd.f32 %v1837_v61, %v1669_v37  ;;  %v2112_v5 = vrot.slane %v1998_v52, 2  ;;  %v2114_v42 = vrot.slane %v1999_v41, 2  ;;  %v1947_v8 = vadd.f32 %v1839_v22, %v1670_v46 }
 0x1bb   : > { %v2221_v6 = vadd.f32 %v2111_v23, %v1945_v4  ;;  %v2274_v33 = vmul.f32 %v4070_v39, %v4372_v38  ;;  %v2275_v31 = vmul.f32 %v4070_v39, %v4417_v48  ;;  %v2387_v15 = vrot.slane %v2273_v60, 2 }
 0x1bc   : > { %v2113_v55 = vsel %vm1789_vm6, %v2111_v23, %v2112_v5  ;;  %v2115_v63 = vsel %vm1789_vm6, %v2112_v5, %v2114_v42  ;;  %v834_v7 = vmul.f32 %v3544_v26, %v4295_v16  ;;  %v835_v39 = vmul.f32 %v3544_v26, %v4293_v3 }
 0x1bd   : > { %v2222_v25 = vadd.f32 %v2113_v55, %v1946_v17  ;;  %v2223_v51 = vadd.f32 %v2115_v63, %v1947_v8  ;;  %v2388_v30 = vrot.slane %v2274_v33, 2  ;;  %v2390_v40 = vrot.slane %v2275_v31, 2 }
 0x1be   : > { %v2497_v1 = vadd.f32 %v2387_v15, %v2221_v6  ;;  %v836_v19 = vmul.f32 %v3544_v26, %v4303_v56  ;;  %v886_v12 = vmul.f32 %v3546_v27, %v4381_v24  ;;  %v887_v54 = vmul.f32 %v3546_v27, %v4364_v43 }
 0x1bf   : > { %v2389_v16 = vsel %vm1789_vm6, %v2387_v15, %v2388_v30  ;;  %v2391_v29 = vsel %vm1789_vm6, %v2388_v30, %v2390_v40  ;;  %v888_v44 = vmul.f32 %v3546_v27, %v4372_v38  ;;  %v986_v13 = vmul.f32 %v3550_v34, %v4437_v14 }
 0x1c0   : > { %v2498_v47 = vadd.f32 %v2389_v16, %v2222_v25  ;;  %v2499_v32 = vadd.f32 %v2391_v29, %v2223_v51  ;;  %v2552_v45 = vadd.f32 %v4236_v9, %v2497_v1  ;;  %v934_v0 = vadd.f32 %v886_v12, %v834_v7 }
 0x1c1   : > { %v935_v28 = vadd.f32 %v887_v54, %v835_v39  ;;  %v936_v11 = vadd.f32 %v888_v44, %v836_v19  ;;  %v987_v20 = vmul.f32 %v3550_v34, %v4435_v53  ;;  %v988_v21 = vmul.f32 %v3550_v34, %v4445_v58 }
 0x1c2   : > { %v2553_v50 = vadd.f32 %v4236_v9, %v2498_v47  ;;  %v2554_v46 = vadd.f32 %v4236_v9, %v2499_v32  ;;  %v2600_v2 = vmax.f32 %v2552_v45, 0.0  ;;  %v1034_v18 = vadd.f32 %v986_v13, %v934_v0 }
 0x1c3   : > { %v1035_v37 = vadd.f32 %v987_v20, %v935_v28  ;;  %v1076_v10 = vmul.f32 %v3552_v35, %v4293_v3  ;;  %v1077_v52 = vmul.f32 %v3552_v35, %v4303_v56  ;;  %v1036_v23 = vadd.f32 %v988_v21, %v936_v11  ;;  %v4488_v20 = vld [vmem:[#allocation2 + $0x198] sm:$0x1] }
 0x1c4   : > { %v2601_v41 = vmax.f32 %v2553_v50, 0.0  ;;  %v2602_v61 = vmax.f32 %v2554_v46, 0.0  ;;  %v2715_v4 = vrot.slane %v2600_v2, 7  ;;  %v1289_v17 = vmul.f32 %v3564_v57, %v4364_v43 }
 0x1c5   : > { %v1151_v60 = vrot.slane %v1076_v10, 1  ;;  %v1152_v22 = vrot.slane %v1077_v52, 1  ;;  %v1290_v5 = vmul.f32 %v3564_v57, %v4372_v38  ;;  %v1501_v6 = vmul.f32 %v3569_v59, %v4435_v53 }
 0x1c6   : > { %v2716_v42 = vrot.slane %v2601_v41, 7  ;;  %v2718_v8 = vrot.slane %v2602_v61, 7  ;;  %v1502_v33 = vmul.f32 %v3569_v59, %v4445_v58  ;;  %v1363_v15 = vrot.slane %v1289_v17, 1 }
 0x1c7   : > { %v1153_v31 = vsel %vm1120_vm5, %v1151_v60, %v1152_v22  ;;  %v1247_v55 = vadd.f32 %v1151_v60, %v1034_v18  ;;  %v1249_v63 = vadd.f32 %v1152_v22, %v1036_v23  ;;  %v1364_v30 = vrot.slane %v1290_v5, 1  ;;  %v4498_v18 = vld [vmem:[%s4947_s3 + $0x8] ss:$0 sm:$0xff] }
 0x1c8   : > { %v2717_v7 = vsel %vm2669_vm7, %v2715_v4, %v2716_v42  ;;  %v2719_v25 = vsel %vm2669_vm7, %v2716_v42, %v2718_v8  ;;  %v1248_v51 = vadd.f32 %v1153_v31, %v1035_v37  ;;  %v1575_v39 = vrot.slane %v1501_v6, 1 }
 0x1c9   : > { %v2791_v40 = vpack.c.bf16 %v2719_v25, %v2717_v7  ;;  %v1459_v1 = vadd.f32 %v1363_v15, %v1247_v55  ;;  %v1576_v19 = vrot.slane %v1502_v33, 1  ;;  %v1365_v12 = vsel %vm1120_vm5, %v1363_v15, %v1364_v30 }
 0x1ca   : > { %v1461_v16 = vadd.f32 %v1364_v30, %v1249_v63  ;;  %v1723_v29 = vmul.f32 %v3559_v49, %v4293_v3  ;;  %v1724_v54 = vmul.f32 %v3559_v49, %v4303_v56  ;;  %v1460_v44 = vadd.f32 %v1365_v12, %v1248_v51  ;;  %v4511_v63 = vld [vmem:[#allocation2 + $0x1a8] sm:$0xff]  ;;  %v4519_v30 = vld [vmem:[#allocation2 + $0x1b0] sm:$0xff] }
 0x1cb   : > { %3250 = vmatmul.mubr.msk.bf16.gmra.mrb[16].mxu1 %vm253_vm1, %v2791_v40  ;;  %v1577_v47 = vsel %vm1120_vm5, %v1575_v39, %v1576_v19  ;;  %v1671_v32 = vadd.f32 %v1575_v39, %v1459_v1  ;;  %v1725_v45 = vmul.f32 %v3559_v49, %v4346_v36  ;;  %v2000_v13 = vmul.f32 %v3573_v62, %v4364_v43 }
 0x1cc   : > { %v1673_v0 = vadd.f32 %v1576_v19, %v1461_v16  ;;  %v1840_v28 = vrot.slane %v1723_v29, 2  ;;  %v1841_v11 = vrot.slane %v1724_v54, 2  ;;  %v1672_v3 = vadd.f32 %v1577_v47, %v1460_v44  ;;  %v4528_v29 = vld [vmem:[#allocation2 + $0x1a0] sm:$0xff] }
 0x1cd   : > { %v1843_v50 = vrot.slane %v1725_v45, 2  ;;  %v2001_v56 = vmul.f32 %v3573_v62, %v4372_v38  ;;  %v2002_v46 = vmul.f32 %v3573_v62, %v4417_v48  ;;  %v2116_v36 = vrot.slane %v2000_v13, 2 }
 0x1ce   : > { %v1842_v2 = vsel %vm1789_vm6, %v1840_v28, %v1841_v11  ;;  %v1948_v21 = vadd.f32 %v1840_v28, %v1671_v32  ;;  %v2276_v37 = vmul.f32 %v4498_v18, %v4435_v53  ;;  %v2277_v60 = vmul.f32 %v4498_v18, %v4445_v58 }
 0x1cf   : > { %v1844_v10 = vsel %vm1789_vm6, %v1841_v11, %v1843_v50  ;;  %v1949_v52 = vadd.f32 %v1842_v2, %v1672_v3  ;;  %v2117_v41 = vrot.slane %v2001_v56, 2  ;;  %v2119_v61 = vrot.slane %v2002_v46, 2 }
 0x1d0   : > { %v1950_v4 = vadd.f32 %v1844_v10, %v1673_v0  ;;  %v2224_v23 = vadd.f32 %v2116_v36, %v1948_v21  ;;  %v2278_v22 = vmul.f32 %v4498_v18, %v4488_v20  ;;  %v2392_v42 = vrot.slane %v2276_v37, 2 }
 0x1d1   : > { %v2118_v17 = vsel %vm1789_vm6, %v2116_v36, %v2117_v41  ;;  %v2120_v5 = vsel %vm1789_vm6, %v2117_v41, %v2119_v61  ;;  %v837_v8 = vmul.f32 %v3544_v26, %v4381_v24  ;;  %v2393_v31 = vrot.slane %v2277_v60, 2 }
 0x1d2   : > { %v2225_v6 = vadd.f32 %v2118_v17, %v1949_v52  ;;  %v2226_v33 = vadd.f32 %v2120_v5, %v1950_v4  ;;  %v2395_v55 = vrot.slane %v2278_v22, 2  ;;  %v2500_v15 = vadd.f32 %v2392_v42, %v2224_v23 }
 0x1d3   : > { %v838_v7 = vmul.f32 %v3544_v26, %v4364_v43  ;;  %v839_v25 = vmul.f32 %v3544_v26, %v4372_v38  ;;  %v889_v51 = vmul.f32 %v3546_v27, %v4437_v14  ;;  %v2394_v24 = vsel %vm1789_vm6, %v2392_v42, %v2393_v31 }
 0x1d4   : > { %v2396_v40 = vsel %vm1789_vm6, %v2393_v31, %v2395_v55  ;;  %v890_v1 = vmul.f32 %v3546_v27, %v4435_v53  ;;  %v891_v39 = vmul.f32 %v3546_v27, %v4445_v58  ;;  %v2501_v19 = vadd.f32 %v2394_v24, %v2225_v6 }
 0x1d5   : > { %v2502_v12 = vadd.f32 %v2396_v40, %v2226_v33  ;;  %v2555_v16 = vadd.f32 %v4236_v9, %v2500_v15  ;;  %v937_v54 = vadd.f32 %v889_v51, %v837_v8  ;;  %v989_v32 = vmul.f32 %v3550_v34, %v4528_v29 }
 0x1d6   : > { %v938_v44 = vadd.f32 %v890_v1, %v838_v7  ;;  %v939_v47 = vadd.f32 %v891_v39, %v839_v25  ;;  %v990_v45 = vmul.f32 %v3550_v34, %v4511_v63  ;;  %v2556_v0 = vadd.f32 %v4236_v9, %v2501_v19 }
 0x1d7   : > { %v2557_v28 = vadd.f32 %v4236_v9, %v2502_v12  ;;  %v2603_v11 = vmax.f32 %v2555_v16, 0.0  ;;  %v991_v13 = vmul.f32 %v3550_v34, %v4519_v30  ;;  %v1037_v3 = vadd.f32 %v989_v32, %v937_v54 }
 0x1d8   : > { %v1038_v50 = vadd.f32 %v990_v45, %v938_v44  ;;  %v1078_v56 = vmul.f32 %v3552_v35, %v4364_v43  ;;  %v1079_v46 = vmul.f32 %v3552_v35, %v4372_v38  ;;  %v2604_v2 = vmax.f32 %v2556_v0, 0.0  ;;  %v4564_v0 = vld [vmem:[#allocation2 + $0x1b8] sm:$0x1] }
 0x1d9   : > { %v2605_v21 = vmax.f32 %v2557_v28, 0.0  ;;  %v2720_v36 = vrot.slane %v2603_v11, 7  ;;  %v1039_v37 = vadd.f32 %v991_v13, %v939_v47  ;;  %v1291_v41 = vmul.f32 %v3564_v57, %v4435_v53 }
 0x1da   : > { %v1154_v10 = vrot.slane %v1078_v56, 1  ;;  %v1155_v52 = vrot.slane %v1079_v46, 1  ;;  %v1292_v61 = vmul.f32 %v3564_v57, %v4445_v58  ;;  %v2721_v4 = vrot.slane %v2604_v2, 7 }
 0x1db   : > { %v2723_v23 = vrot.slane %v2605_v21, 7  ;;  %v1503_v60 = vmul.f32 %v3569_v59, %v4511_v63  ;;  %v1504_v22 = vmul.f32 %v3569_v59, %v4519_v30  ;;  %v1366_v8 = vrot.slane %v1291_v41, 1 }
 0x1dc   : > { %v1156_v17 = vsel %vm1120_vm5, %v1154_v10, %v1155_v52  ;;  %v1250_v5 = vadd.f32 %v1154_v10, %v1037_v3  ;;  %v1252_v42 = vadd.f32 %v1155_v52, %v1039_v37  ;;  %v2722_v6 = vsel %vm2669_vm7, %v2720_v36, %v2721_v4 }
 0x1dd   : > { %v2724_v33 = vsel %vm2669_vm7, %v2721_v4, %v2723_v23  ;;  %v1251_v31 = vadd.f32 %v1156_v17, %v1038_v50  ;;  %v1367_v55 = vrot.slane %v1292_v61, 1  ;;  %v1578_v25 = vrot.slane %v1503_v60, 1 }
 0x1de   : > { %v2792_v15 = vpack.c.bf16 %v2724_v33, %v2722_v6  ;;  %v1462_v7 = vadd.f32 %v1366_v8, %v1250_v5  ;;  %v1579_v51 = vrot.slane %v1504_v22, 1  ;;  %v1726_v1 = vmul.f32 %v3559_v49, %v4364_v43  ;;  %v4584_v6 = vld [vmem:[#allocation2 + $0x1c0] sm:$0xff] }
 0x1df   : > { %v1368_v24 = vsel %vm1120_vm5, %v1366_v8, %v1367_v55  ;;  %v1464_v40 = vadd.f32 %v1367_v55, %v1252_v42  ;;  %v1727_v39 = vmul.f32 %v3559_v49, %v4372_v38  ;;  %v1728_v54 = vmul.f32 %v3559_v49, %v4417_v48  ;;  %v4582_v42 = vld [vmem:[#allocation2 + $0x1c8] sm:$0xff] }
 0x1e0   : > { %3253 = vmatprep.mubr.msk.bf16.mxu1 %vm253_vm1, %v2792_v15  ;;  %v1463_v19 = vadd.f32 %v1368_v24, %v1251_v31  ;;  %v1580_v12 = vsel %vm1120_vm5, %v1578_v25, %v1579_v51  ;;  %v1674_v16 = vadd.f32 %v1578_v25, %v1462_v7  ;;  %v1845_v47 = vrot.slane %v1726_v1, 2  ;;  %v4592_v15 = vld [vmem:[#allocation2 + $0x1d0] sm:$0xff] }
 0x1e1   : > { %v1676_v44 = vadd.f32 %v1579_v51, %v1464_v40  ;;  %v1846_v32 = vrot.slane %v1727_v39, 2  ;;  %v2003_v45 = vmul.f32 %v3573_v62, %v4435_v53  ;;  %v1848_v28 = vrot.slane %v1728_v54, 2 }
 0x1e2   : > { %v1675_v43 = vadd.f32 %v1580_v12, %v1463_v19  ;;  %v2004_v38 = vmul.f32 %v3573_v62, %v4445_v58  ;;  %v2005_v11 = vmul.f32 %v3573_v62, %v4488_v20  ;;  %v1951_v3 = vadd.f32 %v1845_v47, %v1674_v16 }
 0x1e3   : > { %v1847_v13 = vsel %vm1789_vm6, %v1845_v47, %v1846_v32  ;;  %v2121_v48 = vrot.slane %v2003_v45, 2  ;;  %v2279_v50 = vmul.f32 %v4498_v18, %v4511_v63  ;;  %v1849_v56 = vsel %vm1789_vm6, %v1846_v32, %v1848_v28 }
 0x1e4   : > { %v1952_v46 = vadd.f32 %v1847_v13, %v1675_v43  ;;  %v2122_v2 = vrot.slane %v2004_v38, 2  ;;  %v2124_v21 = vrot.slane %v2005_v11, 2  ;;  %v1953_v36 = vadd.f32 %v1849_v56, %v1676_v44 }
 0x1e5   : > { %v2227_v37 = vadd.f32 %v2121_v48, %v1951_v3  ;;  %v2280_v10 = vmul.f32 %v4498_v18, %v4519_v30  ;;  %v2281_v52 = vmul.f32 %v4498_v18, %v4564_v0  ;;  %v2397_v4 = vrot.slane %v2279_v50, 2 }
 0x1e6   : > { %v2123_v41 = vsel %vm1789_vm6, %v2121_v48, %v2122_v2  ;;  %v2125_v61 = vsel %vm1789_vm6, %v2122_v2, %v2124_v21  ;;  %v840_v23 = vmul.f32 %v3544_v26, %v4437_v14  ;;  %v841_v33 = vmul.f32 %v3544_v26, %v4435_v53 }
 0x1e7   : > { %v2228_v60 = vadd.f32 %v2123_v41, %v1952_v46  ;;  %v2229_v22 = vadd.f32 %v2125_v61, %v1953_v36  ;;  %v2398_v17 = vrot.slane %v2280_v10, 2  ;;  %v2400_v5 = vrot.slane %v2281_v52, 2 }
 0x1e8   : > { %v2503_v8 = vadd.f32 %v2397_v4, %v2227_v37  ;;  %v842_v31 = vmul.f32 %v3544_v26, %v4445_v58  ;;  %v892_v55 = vmul.f32 %v3546_v27, %v4528_v29  ;;  %v893_v25 = vmul.f32 %v3546_v27, %v4511_v63 }
 0x1e9   : > { %v2399_v14 = vsel %vm1789_vm6, %v2397_v4, %v2398_v17  ;;  %v2401_v7 = vsel %vm1789_vm6, %v2398_v17, %v2400_v5  ;;  %v894_v51 = vmul.f32 %v3546_v27, %v4519_v30  ;;  %v992_v16 = vmul.f32 %v3550_v34, %v4584_v6 }
 0x1ea   : > { %v2504_v24 = vadd.f32 %v2399_v14, %v2228_v60  ;;  %v2505_v40 = vadd.f32 %v2401_v7, %v2229_v22  ;;  %v2558_v1 = vadd.f32 %v4236_v9, %v2503_v8  ;;  %v940_v39 = vadd.f32 %v892_v55, %v840_v23 }
 0x1eb   : > { %v941_v19 = vadd.f32 %v893_v25, %v841_v33  ;;  %v942_v12 = vadd.f32 %v894_v51, %v842_v31  ;;  %v993_v54 = vmul.f32 %v3550_v34, %v4582_v42  ;;  %v994_v45 = vmul.f32 %v3550_v34, %v4592_v15 }
 0x1ec   : > { %v2559_v44 = vadd.f32 %v4236_v9, %v2504_v24  ;;  %v2560_v47 = vadd.f32 %v4236_v9, %v2505_v40  ;;  %v2606_v32 = vmax.f32 %v2558_v1, 0.0  ;;  %v1040_v43 = vadd.f32 %v992_v16, %v940_v39 }
 0x1ed   : > { %v1041_v28 = vadd.f32 %v993_v54, %v941_v19  ;;  %v1080_v38 = vmul.f32 %v3552_v35, %v4435_v53  ;;  %v1081_v11 = vmul.f32 %v3552_v35, %v4445_v58  ;;  %v1042_v50 = vadd.f32 %v994_v45, %v942_v12  ;;  %v4635_v54 = vld [vmem:[#allocation2 + $0x1d8] sm:$0x1] }
 0x1ee   : > { %v2607_v13 = vmax.f32 %v2559_v44, 0.0  ;;  %v2608_v3 = vmax.f32 %v2560_v47, 0.0  ;;  %v2725_v48 = vrot.slane %v2606_v32, 7  ;;  %v1293_v9 = vmul.f32 %v3564_v57, %v4511_v63 }
 0x1ef   : > { %v1157_v56 = vrot.slane %v1080_v38, 1  ;;  %v1158_v46 = vrot.slane %v1081_v11, 1  ;;  %v1294_v2 = vmul.f32 %v3564_v57, %v4519_v30  ;;  %v1505_v37 = vmul.f32 %v3569_v59, %v4582_v42 }
 0x1f0   : > { %v2726_v21 = vrot.slane %v2607_v13, 7  ;;  %v2728_v36 = vrot.slane %v2608_v3, 7  ;;  %v1506_v10 = vmul.f32 %v3569_v59, %v4592_v15  ;;  %v1369_v4 = vrot.slane %v1293_v9, 1 }
 0x1f1   : > { %v1159_v52 = vsel %vm1120_vm5, %v1157_v56, %v1158_v46  ;;  %v1253_v41 = vadd.f32 %v1157_v56, %v1040_v43  ;;  %v1255_v61 = vadd.f32 %v1158_v46, %v1042_v50  ;;  %v1370_v17 = vrot.slane %v1294_v2, 1 }
 0x1f2   : > { %v2727_v23 = vsel %vm2669_vm7, %v2725_v48, %v2726_v21  ;;  %v2729_v60 = vsel %vm2669_vm7, %v2726_v21, %v2728_v36  ;;  %v1254_v22 = vadd.f32 %v1159_v52, %v1041_v28  ;;  %v1581_v33 = vrot.slane %v1505_v37, 1 }
 0x1f3   : > { %v2793_v5 = vpack.c.bf16 %v2729_v60, %v2727_v23  ;;  %v1465_v8 = vadd.f32 %v1369_v4, %v1253_v41  ;;  %v1582_v31 = vrot.slane %v1506_v10, 1  ;;  %v1371_v55 = vsel %vm1120_vm5, %v1369_v4, %v1370_v17  ;;  %v4654_v41 = vld [vmem:[#allocation2 + $0x1e8] sm:$0xff] }
 0x1f4   : > { %v1467_v14 = vadd.f32 %v1370_v17, %v1255_v61  ;;  %v1729_v7 = vmul.f32 %v3559_v49, %v4435_v53  ;;  %v1730_v25 = vmul.f32 %v3559_v49, %v4445_v58  ;;  %v1466_v51 = vadd.f32 %v1371_v55, %v1254_v22  ;;  %v4678_v55 = vld [vmem:[%s4948_s4] ss:$0 sm:$0xff] }
 0x1f5   : > { %3254 = vmatmul.mubr.msk.bf16.gmra.mrb[20].mxu1 %vm253_vm1, %v2793_v5  ;;  %v1583_v24 = vsel %vm1120_vm5, %v1581_v33, %v1582_v31  ;;  %v1677_v40 = vadd.f32 %v1581_v33, %v1465_v8  ;;  %v1731_v1 = vmul.f32 %v3559_v49, %v4488_v20  ;;  %v2006_v16 = vmul.f32 %v3573_v62, %v4511_v63 }
 0x1f6   : > { %v1679_v39 = vadd.f32 %v1582_v31, %v1467_v14  ;;  %v1850_v19 = vrot.slane %v1729_v7, 2  ;;  %v1851_v12 = vrot.slane %v1730_v25, 2  ;;  %v1678_v53 = vadd.f32 %v1583_v24, %v1466_v51  ;;  %v4681_v7 = vld [vmem:[#allocation2 + $0x1e0] sm:$0xff] }
 0x1f7   : > { %v1853_v58 = vrot.slane %v1731_v1, 2  ;;  %v2007_v44 = vmul.f32 %v3573_v62, %v4519_v30  ;;  %v2008_v47 = vmul.f32 %v3573_v62, %v4564_v0  ;;  %v2126_v45 = vrot.slane %v2006_v16, 2 }
 0x1f8   : > { %v1852_v32 = vsel %vm1789_vm6, %v1850_v19, %v1851_v12  ;;  %v1954_v20 = vadd.f32 %v1850_v19, %v1677_v40  ;;  %v2282_v43 = vmul.f32 %v4498_v18, %v4582_v42  ;;  %v2283_v50 = vmul.f32 %v4498_v18, %v4592_v15 }
 0x1f9   : > { %v1854_v28 = vsel %vm1789_vm6, %v1851_v12, %v1853_v58  ;;  %v1955_v38 = vadd.f32 %v1852_v32, %v1678_v53  ;;  %v2127_v11 = vrot.slane %v2007_v44, 2  ;;  %v2129_v13 = vrot.slane %v2008_v47, 2 }
 0x1fa   : > { %v1956_v3 = vadd.f32 %v1854_v28, %v1679_v39  ;;  %v2230_v48 = vadd.f32 %v2126_v45, %v1954_v20  ;;  %v2284_v56 = vmul.f32 %v4498_v18, %v4635_v54  ;;  %v2402_v2 = vrot.slane %v2282_v43, 2 }
 0x1fb   : > { %v2128_v46 = vsel %vm1789_vm6, %v2126_v45, %v2127_v11  ;;  %v2130_v9 = vsel %vm1789_vm6, %v2127_v11, %v2129_v13  ;;  %v843_v21 = vmul.f32 %v3544_v26, %v4528_v29  ;;  %v2403_v10 = vrot.slane %v2283_v50, 2  ;;  %v4667_v29 = vld [vmem:[#allocation2 + $0x1f0] sm:$0xff] }
 0x1fc   : > { %v2231_v36 = vadd.f32 %v2128_v46, %v1955_v38  ;;  %v2232_v37 = vadd.f32 %v2130_v9, %v1956_v3  ;;  %v2405_v52 = vrot.slane %v2284_v56, 2  ;;  %v2506_v61 = vadd.f32 %v2402_v2, %v2230_v48 }
 0x1fd   : > { %v844_v4 = vmul.f32 %v3544_v26, %v4511_v63  ;;  %v845_v23 = vmul.f32 %v3544_v26, %v4519_v30  ;;  %v895_v60 = vmul.f32 %v3546_v27, %v4584_v6  ;;  %v2404_v22 = vsel %vm1789_vm6, %v2402_v2, %v2403_v10  ;;  %v3235_v51 = vpop.f32.mrb[0].mxu1 }
 0x1fe   : > { %v2406_v17 = vsel %vm1789_vm6, %v2403_v10, %v2405_v52  ;;  %v896_v5 = vmul.f32 %v3546_v27, %v4582_v42  ;;  %v897_v8 = vmul.f32 %v3546_v27, %v4592_v15  ;;  %v2507_v33 = vadd.f32 %v2404_v22, %v2231_v36  ;;  %3014 = vst.msk [vmem:[%s4665_s25 + $0x10] sm:$0xff] %vm253_vm1, %v3235_v51  ;;  %v2885_v19 = vpop.f32.mrb[1].mxu1 }
 0x1ff   : > { %v2508_v31 = vadd.f32 %v2406_v17, %v2232_v37  ;;  %v2561_v14 = vadd.f32 %v4678_v55, %v2506_v61  ;;  %v943_v25 = vadd.f32 %v895_v60, %v843_v21  ;;  %v995_v1 = vmul.f32 %v3550_v34, %v4681_v7  ;;  %3012 = vst.msk [vmem:[%s4665_s25] sm:$0xff] %vm253_vm1, %v2885_v19  ;;  %v3236_v44 = vpop.f32.mrb[2].mxu1 }
 0x200   : > { %v944_v24 = vadd.f32 %v896_v5, %v844_v4  ;;  %v945_v40 = vadd.f32 %v897_v8, %v845_v23  ;;  %v996_v39 = vmul.f32 %v3550_v34, %v4654_v41  ;;  %v2562_v12 = vadd.f32 %v4678_v55, %v2507_v33  ;;  %3015 = vst.msk [vmem:[%s4665_s25 + $0x18] sm:$0xff] %vm253_vm1, %v3236_v44  ;;  %v2888_v43 = vpop.f32.mrb[3].mxu1 }
 0x201   : > { %v2563_v16 = vadd.f32 %v4678_v55, %v2508_v31  ;;  %v2609_v53 = vmax.f32 %v2561_v14, 0.0  ;;  %v997_v58 = vmul.f32 %v3550_v34, %v4667_v29  ;;  %v1043_v47 = vadd.f32 %v995_v1, %v943_v25  ;;  %3013 = vst.msk [vmem:[%s4665_s25 + $0x8] sm:$0xff] %vm253_vm1, %v2888_v43 }
 0x202   : > { %v1044_v32 = vadd.f32 %v996_v39, %v944_v24  ;;  %v1082_v20 = vmul.f32 %v3552_v35, %v4511_v63  ;;  %v1083_v45 = vmul.f32 %v3552_v35, %v4519_v30  ;;  %v2610_v28 = vmax.f32 %v2562_v12, 0.0 }
 0x203   : > { %v2611_v38 = vmax.f32 %v2563_v16, 0.0  ;;  %v2730_v11 = vrot.slane %v2609_v53, 7  ;;  %v1045_v13 = vadd.f32 %v997_v58, %v945_v40  ;;  %v1295_v50 = vmul.f32 %v3564_v57, %v4582_v42  ;;  %v4725_v53 = vld [vmem:[#allocation2 + $0x1f8] sm:$0x1] }
 0x204   : > { %v1160_v3 = vrot.slane %v1082_v20, 1  ;;  %v1161_v48 = vrot.slane %v1083_v45, 1  ;;  %v1296_v56 = vmul.f32 %v3564_v57, %v4592_v15  ;;  %v2731_v46 = vrot.slane %v2610_v28, 7 }
 0x205   : > { %v2733_v9 = vrot.slane %v2611_v38, 7  ;;  %v1507_v2 = vmul.f32 %v3569_v59, %v4654_v41  ;;  %v1508_v21 = vmul.f32 %v3569_v59, %v4667_v29  ;;  %v1372_v52 = vrot.slane %v1295_v50, 1 }
 0x206   : > { %v1162_v36 = vsel %vm1120_vm5, %v1160_v3, %v1161_v48  ;;  %v1256_v37 = vadd.f32 %v1160_v3, %v1043_v47  ;;  %v1258_v10 = vadd.f32 %v1161_v48, %v1045_v13  ;;  %v2732_v61 = vsel %vm2669_vm7, %v2730_v11, %v2731_v46 }
 0x207   : > { %v2734_v4 = vsel %vm2669_vm7, %v2731_v46, %v2733_v9  ;;  %v1257_v23 = vadd.f32 %v1162_v36, %v1044_v32  ;;  %v1373_v60 = vrot.slane %v1296_v56, 1  ;;  %v1584_v5 = vrot.slane %v1507_v2, 1 }
 0x208   : > { %v2794_v22 = vpack.c.bf16 %v2734_v4, %v2732_v61  ;;  %v1468_v17 = vadd.f32 %v1372_v52, %v1256_v37  ;;  %v1585_v8 = vrot.slane %v1508_v21, 1  ;;  %v1732_v14 = vmul.f32 %v3559_v49, %v4511_v63  ;;  %v4745_v61 = vld [vmem:[#allocation2 + $0x208] sm:$0xff] }
 0x209   : > { %v1374_v33 = vsel %vm1120_vm5, %v1372_v52, %v1373_v60  ;;  %v1470_v31 = vadd.f32 %v1373_v60, %v1258_v10  ;;  %v1733_v25 = vmul.f32 %v3559_v49, %v4519_v30  ;;  %v1734_v1 = vmul.f32 %v3559_v49, %v4564_v0  ;;  %v4743_v52 = vld [vmem:[#allocation2 + $0x200] sm:$0xff] }
 0x20a   : > { %3257 = vmatprep.mubr.msk.bf16.mxu1 %vm253_vm1, %v2794_v22  ;;  %v1469_v51 = vadd.f32 %v1374_v33, %v1257_v23  ;;  %v1586_v24 = vsel %vm1120_vm5, %v1584_v5, %v1585_v8  ;;  %v1680_v40 = vadd.f32 %v1584_v5, %v1468_v17  ;;  %v1855_v19 = vrot.slane %v1732_v14, 2  ;;  %v4755_v17 = vld [vmem:[#allocation2 + $0x210] sm:$0xff] }
 0x20b   : > { %v1682_v39 = vadd.f32 %v1585_v8, %v1470_v31  ;;  %v1856_v12 = vrot.slane %v1733_v25, 2  ;;  %v2009_v16 = vmul.f32 %v3573_v62, %v4582_v42  ;;  %v1858_v58 = vrot.slane %v1734_v1, 2 }
 0x20c   : > { %v1681_v63 = vadd.f32 %v1586_v24, %v1469_v51  ;;  %v2010_v30 = vmul.f32 %v3573_v62, %v4592_v15  ;;  %v2011_v44 = vmul.f32 %v3573_v62, %v4635_v54  ;;  %v1957_v32 = vadd.f32 %v1855_v19, %v1680_v40 }
 0x20d   : > { %v1857_v47 = vsel %vm1789_vm6, %v1855_v19, %v1856_v12  ;;  %v2131_v0 = vrot.slane %v2009_v16, 2  ;;  %v2285_v20 = vmul.f32 %v4498_v18, %v4654_v41  ;;  %v1859_v45 = vsel %vm1789_vm6, %v1856_v12, %v1858_v58 }
 0x20e   : > { %v1958_v43 = vadd.f32 %v1857_v47, %v1681_v63  ;;  %v2132_v28 = vrot.slane %v2010_v30, 2  ;;  %v2134_v38 = vrot.slane %v2011_v44, 2  ;;  %v1959_v11 = vadd.f32 %v1859_v45, %v1682_v39 }
 0x20f   : > { %v2233_v13 = vadd.f32 %v2131_v0, %v1957_v32  ;;  %v2286_v3 = vmul.f32 %v4498_v18, %v4667_v29  ;;  %v2287_v48 = vmul.f32 %v4498_v18, %v4725_v53  ;;  %v2407_v46 = vrot.slane %v2285_v20, 2 }
 0x210   : > { %v2133_v50 = vsel %vm1789_vm6, %v2131_v0, %v2132_v28  ;;  %v2135_v56 = vsel %vm1789_vm6, %v2132_v28, %v2134_v38  ;;  %v846_v9 = vmul.f32 %v3544_v26, %v4584_v6  ;;  %v847_v4 = vmul.f32 %v3544_v26, %v4582_v42 }
 0x211   : > { %v2234_v2 = vadd.f32 %v2133_v50, %v1958_v43  ;;  %v2235_v21 = vadd.f32 %v2135_v56, %v1959_v11  ;;  %v2408_v36 = vrot.slane %v2286_v3, 2  ;;  %v2410_v37 = vrot.slane %v2287_v48, 2 }
 0x212   : > { %v2509_v10 = vadd.f32 %v2407_v46, %v2233_v13  ;;  %v848_v23 = vmul.f32 %v3544_v26, %v4592_v15  ;;  %v898_v60 = vmul.f32 %v3546_v27, %v4681_v7  ;;  %v899_v5 = vmul.f32 %v3546_v27, %v4654_v41 }
 0x213   : > { %v2409_v6 = vsel %vm1789_vm6, %v2407_v46, %v2408_v36  ;;  %v2411_v22 = vsel %vm1789_vm6, %v2408_v36, %v2410_v37  ;;  %v900_v8 = vmul.f32 %v3546_v27, %v4667_v29  ;;  %v998_v40 = vmul.f32 %v3550_v34, %v4743_v52 }
 0x214   : > { %v2510_v33 = vadd.f32 %v2409_v6, %v2234_v2  ;;  %v2511_v31 = vadd.f32 %v2411_v22, %v2235_v21  ;;  %v2564_v14 = vadd.f32 %v4678_v55, %v2509_v10  ;;  %v946_v25 = vadd.f32 %v898_v60, %v846_v9 }
 0x215   : > { %v947_v51 = vadd.f32 %v899_v5, %v847_v4  ;;  %v948_v24 = vadd.f32 %v900_v8, %v848_v23  ;;  %v999_v1 = vmul.f32 %v3550_v34, %v4745_v61  ;;  %v1000_v16 = vmul.f32 %v3550_v34, %v4755_v17 }
 0x216   : > { %v2565_v39 = vadd.f32 %v4678_v55, %v2510_v33  ;;  %v2566_v19 = vadd.f32 %v4678_v55, %v2511_v31  ;;  %v2612_v12 = vmax.f32 %v2564_v14, 0.0  ;;  %v1046_v63 = vadd.f32 %v998_v40, %v946_v25 }
 0x217   : > { %v1047_v58 = vadd.f32 %v999_v1, %v947_v51  ;;  %v1084_v30 = vmul.f32 %v3552_v35, %v4582_v42  ;;  %v1085_v44 = vmul.f32 %v3552_v35, %v4592_v15  ;;  %v1048_v20 = vadd.f32 %v1000_v16, %v948_v24 }
 0x218   : > { %v2613_v47 = vmax.f32 %v2565_v39, 0.0  ;;  %v2614_v32 = vmax.f32 %v2566_v19, 0.0  ;;  %v2735_v0 = vrot.slane %v2612_v12, 7  ;;  %v1297_v28 = vmul.f32 %v3564_v57, %v4654_v41  ;;  %v4796_v39 = vld [vmem:[#allocation2 + $0x218] sm:$0x1] }
 0x219   : > { %v1163_v45 = vrot.slane %v1084_v30, 1  ;;  %v1164_v43 = vrot.slane %v1085_v44, 1  ;;  %v1298_v38 = vmul.f32 %v3564_v57, %v4667_v29  ;;  %v1509_v3 = vmul.f32 %v3569_v59, %v4745_v61 }
 0x21a   : > { %v2736_v11 = vrot.slane %v2613_v47, 7  ;;  %v2738_v13 = vrot.slane %v2614_v32, 7  ;;  %v1510_v48 = vmul.f32 %v3569_v59, %v4755_v17  ;;  %v1375_v9 = vrot.slane %v1297_v28, 1 }
 0x21b   : > { %v1165_v50 = vsel %vm1120_vm5, %v1163_v45, %v1164_v43  ;;  %v1259_v56 = vadd.f32 %v1163_v45, %v1046_v63  ;;  %v1261_v46 = vadd.f32 %v1164_v43, %v1048_v20  ;;  %v1376_v37 = vrot.slane %v1298_v38, 1 }
 0x21c   : > { %v2737_v2 = vsel %vm2669_vm7, %v2735_v0, %v2736_v11  ;;  %v2739_v21 = vsel %vm2669_vm7, %v2736_v11, %v2738_v13  ;;  %v1260_v36 = vadd.f32 %v1165_v50, %v1047_v58  ;;  %v1587_v23 = vrot.slane %v1509_v3, 1 }
 0x21d   : > { %v2795_v10 = vpack.c.bf16 %v2739_v21, %v2737_v2  ;;  %v1471_v4 = vadd.f32 %v1375_v9, %v1259_v56  ;;  %v1588_v60 = vrot.slane %v1510_v48, 1  ;;  %v1377_v6 = vsel %vm1120_vm5, %v1375_v9, %v1376_v37  ;;  %v794_v2 = vld [vmem:[#allocation2 + $0x220] sm:$0xff]  ;;  %v4814_v21 = vld [vmem:[#allocation2 + $0x228] sm:$0xff] }
 0x21e   : > { %v1473_v22 = vadd.f32 %v1376_v37, %v1261_v46  ;;  %v1735_v5 = vmul.f32 %v3559_v49, %v4582_v42  ;;  %v1736_v8 = vmul.f32 %v3559_v49, %v4592_v15  ;;  %v1472_v33 = vadd.f32 %v1377_v6, %v1260_v36 }
 0x21f   : > { %3258 = vmatmul.mubr.msk.bf16.gmra.mrb[24].mxu1 %vm253_vm1, %v2795_v10  ;;  %v1589_v31 = vsel %vm1120_vm5, %v1587_v23, %v1588_v60  ;;  %v1683_v14 = vadd.f32 %v1587_v23, %v1471_v4  ;;  %v1737_v25 = vmul.f32 %v3559_v49, %v4635_v54  ;;  %v2012_v1 = vmul.f32 %v3573_v62, %v4654_v41 }
 0x220   : > { %v1685_v51 = vadd.f32 %v1588_v60, %v1473_v22  ;;  %v1860_v24 = vrot.slane %v1735_v5, 2  ;;  %v1861_v40 = vrot.slane %v1736_v8, 2  ;;  %v1684_v42 = vadd.f32 %v1589_v31, %v1472_v33  ;;  %v4826_v60 = vld [vmem:[#allocation2 + $0x230] sm:$0xff] }
 0x221   : > { %v1863_v19 = vrot.slane %v1737_v25, 2  ;;  %v2013_v15 = vmul.f32 %v3573_v62, %v4667_v29  ;;  %v2014_v12 = vmul.f32 %v3573_v62, %v4725_v53  ;;  %v2136_v54 = vrot.slane %v2012_v1, 2 }
 0x222   : > { %v1862_v16 = vsel %vm1789_vm6, %v1860_v24, %v1861_v40  ;;  %v1960_v63 = vadd.f32 %v1860_v24, %v1683_v14  ;;  %v2288_v58 = vmul.f32 %v4498_v18, %v4745_v61  ;;  %v2289_v45 = vmul.f32 %v4498_v18, %v4755_v17 }
 0x223   : > { %v1864_v30 = vsel %vm1789_vm6, %v1861_v40, %v1863_v19  ;;  %v1961_v44 = vadd.f32 %v1862_v16, %v1684_v42  ;;  %v2137_v47 = vrot.slane %v2013_v15, 2  ;;  %v2139_v32 = vrot.slane %v2014_v12, 2 }
 0x224   : > { %v1962_v0 = vadd.f32 %v1864_v30, %v1685_v51  ;;  %v2236_v20 = vadd.f32 %v2136_v54, %v1960_v63  ;;  %v2290_v43 = vmul.f32 %v4498_v18, %v4796_v39  ;;  %v2412_v11 = vrot.slane %v2288_v58, 2 }
 0x225   : > { %v2138_v28 = vsel %vm1789_vm6, %v2136_v54, %v2137_v47  ;;  %v2140_v38 = vsel %vm1789_vm6, %v2137_v47, %v2139_v32  ;;  %v849_v13 = vmul.f32 %v3544_v26, %v4681_v7  ;;  %v2413_v50 = vrot.slane %v2289_v45, 2 }
 0x226   : > { %v2237_v3 = vadd.f32 %v2138_v28, %v1961_v44  ;;  %v2238_v48 = vadd.f32 %v2140_v38, %v1962_v0  ;;  %v2415_v56 = vrot.slane %v2290_v43, 2  ;;  %v3239_v46 = vpop.f32.mrb[4].mxu1  ;;  %v2512_v9 = vadd.f32 %v2412_v11, %v2236_v20 }
 0x227   : > { %v850_v36 = vmul.f32 %v3544_v26, %v4654_v41  ;;  %v851_v37 = vmul.f32 %v3544_v26, %v4667_v29  ;;  %v901_v7 = vmul.f32 %v3546_v27, %v4743_v52  ;;  %3018 = vst.msk [vmem:[%s4665_s25 + $0x30] sm:$0xff] %vm253_vm1, %v3239_v46  ;;  %v2901_v10 = vpop.f32.mrb[5].mxu1  ;;  %v2414_v4 = vsel %vm1789_vm6, %v2412_v11, %v2413_v50 }
 0x228   : > { %v2416_v23 = vsel %vm1789_vm6, %v2413_v50, %v2415_v56  ;;  %v902_v6 = vmul.f32 %v3546_v27, %v4745_v61  ;;  %v903_v22 = vmul.f32 %v3546_v27, %v4755_v17  ;;  %3016 = vst.msk [vmem:[%s4665_s25 + $0x20] sm:$0xff] %vm253_vm1, %v2901_v10  ;;  %v3240_v26 = vpop.f32.mrb[6].mxu1  ;;  %v2513_v52 = vadd.f32 %v2414_v4, %v2237_v3 }
 0x229   : > { %v2514_v5 = vadd.f32 %v2416_v23, %v2238_v48  ;;  %v2567_v8 = vadd.f32 %v4678_v55, %v2512_v9  ;;  %v949_v33 = vadd.f32 %v901_v7, %v849_v13  ;;  %3019 = vst.msk [vmem:[%s4665_s25 + $0x38] sm:$0xff] %vm253_vm1, %v3240_v26  ;;  %v2904_v31 = vpop.f32.mrb[7].mxu1  ;;  %v1001_v51 = vmul.f32 %v3550_v34, %v794_v2 }
 0x22a   : > { %v950_v14 = vadd.f32 %v902_v6, %v850_v36  ;;  %v951_v25 = vadd.f32 %v903_v22, %v851_v37  ;;  %v1002_v24 = vmul.f32 %v3550_v34, %v4814_v21  ;;  %3017 = vst.msk [vmem:[%s4665_s25 + $0x28] sm:$0xff] %vm253_vm1, %v2904_v31  ;;  %v2568_v27 = vadd.f32 %v4678_v55, %v2513_v52 }
 0x22b   : > { %v2569_v40 = vadd.f32 %v4678_v55, %v2514_v5  ;;  %v2615_v1 = vmax.f32 %v2567_v8, 0.0  ;;  %v1003_v42 = vmul.f32 %v3550_v34, %v4826_v60  ;;  %v1049_v19 = vadd.f32 %v1001_v51, %v949_v33  ;;  %v797_v5 = vld [vmem:[#allocation2 + $0x238] sm:$0x1] }
 0x22c   : > { %v1050_v15 = vadd.f32 %v1002_v24, %v950_v14  ;;  %v1086_v12 = vmul.f32 %v3552_v35, %v4654_v41  ;;  %v1087_v16 = vmul.f32 %v3552_v35, %v4667_v29  ;;  %v2616_v63 = vmax.f32 %v2568_v27, 0.0 }
 0x22d   : > { %v2617_v54 = vmax.f32 %v2569_v40, 0.0  ;;  %v2740_v58 = vrot.slane %v2615_v1, 7  ;;  %v1051_v30 = vadd.f32 %v1003_v42, %v951_v25  ;;  %v1299_v32 = vmul.f32 %v3564_v57, %v4745_v61 }
 0x22e   : > { %v1166_v44 = vrot.slane %v1086_v12, 1  ;;  %v1167_v47 = vrot.slane %v1087_v16, 1  ;;  %v1300_v34 = vmul.f32 %v3564_v57, %v4755_v17  ;;  %v2741_v0 = vrot.slane %v2616_v63, 7 }
 0x22f   : > { %v2743_v20 = vrot.slane %v2617_v54, 7  ;;  %v1511_v45 = vmul.f32 %v3569_v59, %v4814_v21  ;;  %v1512_v35 = vmul.f32 %v3569_v59, %v4826_v60  ;;  %v1378_v11 = vrot.slane %v1299_v32, 1 }
 0x230   : > { %v1168_v43 = vsel %vm1120_vm5, %v1166_v44, %v1167_v47  ;;  %v1262_v28 = vadd.f32 %v1166_v44, %v1049_v19  ;;  %v1264_v38 = vadd.f32 %v1167_v47, %v1051_v30  ;;  %v2742_v13 = vsel %vm2669_vm7, %v2740_v58, %v2741_v0 }
 0x231   : > { %v2744_v3 = vsel %vm2669_vm7, %v2741_v0, %v2743_v20  ;;  %v1263_v48 = vadd.f32 %v1168_v43, %v1050_v15  ;;  %v1379_v50 = vrot.slane %v1300_v34, 1  ;;  %v1590_v46 = vrot.slane %v1511_v45, 1 }
 0x232   : > { %v2796_v57 = vpack.c.bf16 %v2744_v3, %v2742_v13  ;;  %v1474_v56 = vadd.f32 %v1378_v11, %v1262_v28  ;;  %v1591_v9 = vrot.slane %v1512_v35, 1  ;;  %v1738_v59 = vmul.f32 %v3559_v49, %v4654_v41 }
 0x233   : > { %v1380_v2 = vsel %vm1120_vm5, %v1378_v11, %v1379_v50  ;;  %v1476_v36 = vadd.f32 %v1379_v50, %v1264_v38  ;;  %v1739_v37 = vmul.f32 %v3559_v49, %v4667_v29  ;;  %v1740_v23 = vmul.f32 %v3559_v49, %v4725_v53 }
 0x234   : > { %3261 = vmatprep.mubr.msk.bf16.mxu1 %vm253_vm1, %v2796_v57  ;;  %v1475_v7 = vadd.f32 %v1380_v2, %v1263_v48  ;;  %v1592_v10 = vsel %vm1120_vm5, %v1590_v46, %v1591_v9  ;;  %v1686_v4 = vadd.f32 %v1590_v46, %v1474_v56  ;;  %v1865_v22 = vrot.slane %v1738_v59, 2 }
 0x235   : > { %v1688_v6 = vadd.f32 %v1591_v9, %v1476_v36  ;;  %v1866_v26 = vrot.slane %v1739_v37, 2  ;;  %v2015_v52 = vmul.f32 %v3573_v62, %v4745_v61  ;;  %v1868_v8 = vrot.slane %v1740_v23, 2 }
 0x236   : > { %v1687_v41 = vadd.f32 %v1592_v10, %v1475_v7  ;;  %v2016_v29 = vmul.f32 %v3573_v62, %v4755_v17  ;;  %v2017_v33 = vmul.f32 %v3573_v62, %v4796_v39  ;;  %v1963_v14 = vadd.f32 %v1865_v22, %v1686_v4 }
 0x237   : > { %v1867_v31 = vsel %vm1789_vm6, %v1865_v22, %v1866_v26  ;;  %v2141_v25 = vrot.slane %v2015_v52, 2  ;;  %v2291_v49 = vmul.f32 %v4498_v18, %v4814_v21  ;;  %v1869_v53 = vsel %vm1789_vm6, %v1866_v26, %v1868_v8 }
 0x238   : > { %v1964_v51 = vadd.f32 %v1867_v31, %v1687_v41  ;;  %v2142_v61 = vrot.slane %v2016_v29, 2  ;;  %v2144_v24 = vrot.slane %v2017_v33, 2  ;;  %v1965_v27 = vadd.f32 %v1869_v53, %v1688_v6 }
 0x239   : > { %v2239_v40 = vadd.f32 %v2141_v25, %v1963_v14  ;;  %v2292_v17 = vmul.f32 %v4498_v18, %v4826_v60  ;;  %v2293_v1 = vmul.f32 %v4498_v18, %v797_v5  ;;  %v2417_v42 = vrot.slane %v2291_v49, 2 }
 0x23a   : > { %v2143_v62 = vsel %vm1789_vm6, %v2141_v25, %v2142_v61  ;;  %v2145_v39 = vsel %vm1789_vm6, %v2142_v61, %v2144_v24 }
 0x23b   : > { %v2240_v19 = vadd.f32 %v2143_v62, %v1964_v51  ;;  %v2241_v15 = vadd.f32 %v2145_v39, %v1965_v27  ;;  %v2418_v21 = vrot.slane %v2292_v17, 2  ;;  %v2420_v12 = vrot.slane %v2293_v1, 2 }
 0x23c   : > { %v2515_v16 = vadd.f32 %v2417_v42, %v2239_v40 }
 0x23d   : > { %v2419_v63 = vsel %vm1789_vm6, %v2417_v42, %v2418_v21  ;;  %v2421_v54 = vsel %vm1789_vm6, %v2418_v21, %v2420_v12 }
 0x23e   : > { %v2516_v58 = vadd.f32 %v2419_v63, %v2240_v19  ;;  %v2517_v30 = vadd.f32 %v2421_v54, %v2241_v15  ;;  %v2570_v60 = vadd.f32 %v4678_v55, %v2515_v16 }
 0x240   : > { %v2571_v18 = vadd.f32 %v4678_v55, %v2516_v58  ;;  %v2572_v44 = vadd.f32 %v4678_v55, %v2517_v30  ;;  %v2618_v47 = vmax.f32 %v2570_v60, 0.0 }
 0x242   : > { %v2619_v32 = vmax.f32 %v2571_v18, 0.0  ;;  %v2620_v34 = vmax.f32 %v2572_v44, 0.0  ;;  %v2745_v0 = vrot.slane %v2618_v47, 7 }
 0x244   : > { %v2746_v20 = vrot.slane %v2619_v32, 7  ;;  %v2748_v45 = vrot.slane %v2620_v34, 7 }
 0x246   : > { %v2747_v35 = vsel %vm2669_vm7, %v2745_v0, %v2746_v20  ;;  %v2749_v43 = vsel %vm2669_vm7, %v2746_v20, %v2748_v45 }
 0x247   : > { %v2797_v28 = vpack.c.bf16 %v2749_v43, %v2747_v35 }
 0x249   : > { %3262 = vmatmul.mubr.msk.bf16.gmra.mrb[28].mxu1 %vm253_vm1, %v2797_v28 }
 0x24d   : > { %v3243_v55 = vpop.f32.mrb[8].mxu1 }
 0x24e   : > { %3022 = vst.msk [vmem:[%s4665_s25 + $0x50] sm:$0xff] %vm253_vm1, %v3243_v55  ;;  %v2917_v38 = vpop.f32.mrb[9].mxu1 }
 0x24f   : > { %3020 = vst.msk [vmem:[%s4665_s25 + $0x40] sm:$0xff] %vm253_vm1, %v2917_v38  ;;  %v3244_v11 = vpop.f32.mrb[10].mxu1 }
 0x250   : > { %3023 = vst.msk [vmem:[%s4665_s25 + $0x58] sm:$0xff] %vm253_vm1, %v3244_v11  ;;  %v2920_v13 = vpop.f32.mrb[11].mxu1 }
 0x251   : > { %3021 = vst.msk [vmem:[%s4665_s25 + $0x48] sm:$0xff] %vm253_vm1, %v2920_v13 }
 0x274   : > { %v3247_v3 = vpop.f32.mrb[12].mxu1 }
 0x275   : > { %3026 = vst.msk [vmem:[%s4665_s25 + $0x70] sm:$0xff] %vm253_vm1, %v3247_v3  ;;  %v2933_v48 = vpop.f32.mrb[13].mxu1 }
 0x276   : > { %3024 = vst.msk [vmem:[%s4665_s25 + $0x60] sm:$0xff] %vm253_vm1, %v2933_v48  ;;  %v3248_v50 = vpop.f32.mrb[14].mxu1 }
 0x277   : > { %3027 = vst.msk [vmem:[%s4665_s25 + $0x78] sm:$0xff] %vm253_vm1, %v3248_v50  ;;  %v2936_v57 = vpop.f32.mrb[15].mxu1 }
 0x278   : > { %3025 = vst.msk [vmem:[%s4665_s25 + $0x68] sm:$0xff] %vm253_vm1, %v2936_v57 }
 0x29e   : > { %v3251_v56 = vpop.f32.mrb[16].mxu1 }
 0x29f   : > { %3030 = vst.msk [vmem:[%s4665_s25 + $0x90] sm:$0xff] %vm253_vm1, %v3251_v56  ;;  %v2949_v46 = vpop.f32.mrb[17].mxu1 }
 0x2a0   : > { %3028 = vst.msk [vmem:[%s4665_s25 + $0x80] sm:$0xff] %vm253_vm1, %v2949_v46  ;;  %v3252_v9 = vpop.f32.mrb[18].mxu1 }
 0x2a1   : > { %3031 = vst.msk [vmem:[%s4665_s25 + $0x98] sm:$0xff] %vm253_vm1, %v3252_v9  ;;  %v2952_v2 = vpop.f32.mrb[19].mxu1 }
 0x2a2   : > { %3029 = vst.msk [vmem:[%s4665_s25 + $0x88] sm:$0xff] %vm253_vm1, %v2952_v2 }
 0x2c8   : > { %v3255_v36 = vpop.f32.mrb[20].mxu1 }
 0x2c9   : > { %3034 = vst.msk [vmem:[%s4665_s25 + $0xb0] sm:$0xff] %vm253_vm1, %v3255_v36  ;;  %v2965_v59 = vpop.f32.mrb[21].mxu1 }
 0x2ca   : > { %3032 = vst.msk [vmem:[%s4665_s25 + $0xa0] sm:$0xff] %vm253_vm1, %v2965_v59  ;;  %v3256_v37 = vpop.f32.mrb[22].mxu1 }
 0x2cb   : > { %3035 = vst.msk [vmem:[%s4665_s25 + $0xb8] sm:$0xff] %vm253_vm1, %v3256_v37  ;;  %v2968_v7 = vpop.f32.mrb[23].mxu1 }
 0x2cc   : > { %3033 = vst.msk [vmem:[%s4665_s25 + $0xa8] sm:$0xff] %vm253_vm1, %v2968_v7 }
 0x2f2   : > { %v3259_v10 = vpop.f32.mrb[24].mxu1 }
 0x2f3   : > { %3038 = vst.msk [vmem:[%s4665_s25 + $0xd0] sm:$0xff] %vm253_vm1, %v3259_v10  ;;  %v2981_v4 = vpop.f32.mrb[25].mxu1 }
 0x2f4   : > { %3036 = vst.msk [vmem:[%s4665_s25 + $0xc0] sm:$0xff] %vm253_vm1, %v2981_v4  ;;  %v3260_v23 = vpop.f32.mrb[26].mxu1 }
 0x2f5   : > { %3039 = vst.msk [vmem:[%s4665_s25 + $0xd8] sm:$0xff] %vm253_vm1, %v3260_v23  ;;  %v2984_v6 = vpop.f32.mrb[27].mxu1 }
 0x2f6   : > { %3037 = vst.msk [vmem:[%s4665_s25 + $0xc8] sm:$0xff] %vm253_vm1, %v2984_v6 }
 0x31c   : > { %v3263_v22 = vpop.f32.mrb[28].mxu1 }
 0x31d   : > { %3042 = vst.msk [vmem:[%s4665_s25 + $0xf0] sm:$0xff] %vm253_vm1, %v3263_v22  ;;  %v2997_v26 = vpop.f32.mrb[29].mxu1 }
 0x31e   : > { %3040 = vst.msk [vmem:[%s4665_s25 + $0xe0] sm:$0xff] %vm253_vm1, %v2997_v26  ;;  %v3264_v52 = vpop.f32.mrb[30].mxu1 }
 0x31f   : > { %3043 = vst.msk [vmem:[%s4665_s25 + $0xf8] sm:$0xff] %vm253_vm1, %v3264_v52  ;;  %v3000_v5 = vpop.f32.mrb[31].mxu1 }
 0x320   : > { %3041 = vst.msk [vmem:[%s4665_s25 + $0xe8] sm:$0xff] %vm253_vm1, %v3000_v5 }
 0x321 PF: > { %s16_s21 = sadd.s32 1, %s3305_s21  }
 0x322   : > { %p13_p4 = scmp.ge.s32.totalorder %s16_s21, 4  }
 0x324   :  { %15 = sbr.rel (!%p13_p4) target bundleno = 1 (0x1), region = 75 }

</bundles_post_ra>
